<compile_context>
chip_gen: v7x
topology: tpu7x:2x2x1
jax: 0.10.0
libtpu: 0.0.40
codegen_flags: <defaults>
</compile_context>

<pallas_src>
import functools
import math

import jax
import jax.numpy as jnp
import numpy as np
from jax.experimental import pallas as pl
from jax.experimental.pallas import tpu as pltpu


# ---------------------------------------------------------------------------
# Kernel
# ---------------------------------------------------------------------------
def _lowrank_mha_kernel(num_heads, head_dim, seq_len, factored, *refs):
    """One grid step = a (Bt, S, E) slab of batch elements.

    refs = (q_ref, k_ref, v_ref, *weight_refs, o_ref). Weights come in groups
    of 2 (composed: W_eff, b_eff) or 4 (factored: W_l, b_l, W_h, b_h) for the
    q, k, v and out projections; the 1/sqrt(head_dim) scale is pre-folded into
    the q projection by the wrapper. Weight matrices are bf16, biases f32.
    """
    q_ref, k_ref, v_ref = refs[0], refs[1], refs[2]
    o_ref = refs[-1]
    w_refs = refs[3:-1]
    per = 4 if factored else 2
    w_q, w_k, w_v, w_o = (w_refs[i * per:(i + 1) * per] for i in range(4))

    bt = q_ref.shape[0]
    S = seq_len
    E = num_heads * head_dim
    Dh = head_dim
    rows = bt * S

    def proj(x_f32, ws):
        # bf16 MXU inputs, f32 accumulation, f32 bias add.
        if factored:
            wl, bl, wh, bh = ws
            h = jnp.dot(x_f32.astype(jnp.bfloat16), wl[...],
                        preferred_element_type=jnp.float32) + bl[...]
            return jnp.dot(h.astype(jnp.bfloat16), wh[...],
                           preferred_element_type=jnp.float32) + bh[...]
        w, b = ws
        return jnp.dot(x_f32.astype(jnp.bfloat16), w[...],
                       preferred_element_type=jnp.float32) + b[...]

    # (Bt, S, E) -> (Bt*S, E): leading-dim merge (layout preserving, S%8==0)
    # so the projection matmuls see a large M dimension.
    xq = q_ref[...].reshape(rows, E)
    xk = k_ref[...].reshape(rows, E)
    xv = v_ref[...].reshape(rows, E)

    q = proj(xq, w_q).reshape(bt, S, E)      # attention scale folded into w_q
    k = proj(xk, w_k).reshape(bt, S, E)
    v = proj(xv, w_v).reshape(bt, S, E)

    # Batched-heads attention: stack heads along the leading (batch) dim so a
    # single 3-D einsum covers every (batch, head) pair — one score matmul,
    # one softmax and one PV matmul per block instead of num_heads of each,
    # and no per-head masked stores into a scratch slab.
    def split_heads(x):
        return jnp.concatenate(
            [x[:, :, h * Dh:(h + 1) * Dh] for h in range(num_heads)],
            axis=0).astype(jnp.bfloat16)                       # (H*Bt, S, Dh)

    qh, kh, vh = split_heads(q), split_heads(k), split_heads(v)

    s = jnp.einsum('zqd,zkd->zqk', qh, kh,
                   preferred_element_type=jnp.float32)         # (H*Bt, S, S)
    m = jnp.max(s, axis=-1, keepdims=True)
    p = jnp.exp(s - m)
    denom = jnp.sum(p, axis=-1, keepdims=True)
    p = p * pl.reciprocal(denom, approx=True)                  # softmax (EUP)
    # TODO(synk): attn_mask / key_padding_mask / dropout>0 would plug in here.
    oh = jnp.einsum('zqk,zkd->zqd', p.astype(jnp.bfloat16), vh,
                    preferred_element_type=jnp.float32)        # (H*Bt, S, Dh)

    # Re-assemble heads along the embedding (lane) axis, apply the out proj.
    attn = jnp.concatenate(
        [oh[h * bt:(h + 1) * bt] for h in range(num_heads)], axis=-1)
    out = proj(attn.reshape(rows, E), w_o)                     # (rows, E)

    # o_ref is either the plain (Bt, S, E) block or a lane-dense (Bt, S*E)
    # slab; the reshape adapts to whichever was configured.
    o_ref[...] = out.reshape(o_ref.shape).astype(o_ref.dtype)


# ---------------------------------------------------------------------------
# Sizing helpers
# ---------------------------------------------------------------------------
def _tpu_info():
    try:
        return pltpu.get_tpu_info()
    except Exception:
        return None


def _vmem_capacity_bytes():
    info = _tpu_info()
    cap = getattr(info, "vmem_capacity_bytes", None) if info is not None else None
    # Conservative default: assume v7x's 64 MiB/TensorCore if we cannot query.
    return int(cap) if cap else 64 * 1024 * 1024


def _target_rows():
    # v5e's MXU is 128 wide (M=128 already fills it); v6e/v7x's 256-wide MXU
    # and ~600-cycle per-grid-step overhead favour 256+ rows per block.
    info = _tpu_info()
    cv = getattr(info, "chip_version", None) if info is not None else None
    name = str(getattr(cv, "name", cv)).lower()
    if "v5" in name or "5e" in name or "5p" in name:
        return 128
    return 256


def _ceil_to(n, m):
    return -(-n // m) * m


def _block_vmem_bytes(bt, S, E, H):
    """Rough per-block VMEM footprint (lane/sublane padded)."""
    rows = bt * S
    dh = E // H
    lane = lambda n: _ceil_to(n, 128)
    sub = lambda n: _ceil_to(n, 8)
    io = 4 * 2 * bt * sub(S) * lane(E) * 4          # q/k/v/out blocks, 2-buffered
    proj = 4 * sub(rows) * lane(E) * 4              # projected q/k/v + attn (f32)
    heads = 3 * H * bt * sub(S) * lane(dh) * 2      # head-stacked bf16 copies
    scores = H * bt * sub(S) * lane(S) * (4 + 4 + 2)  # scores + exp + probs
    return io + proj + heads + scores


def _weight_vmem_bytes(E, R, compose, buffers=2):
    lane = lambda n: _ceil_to(n, 128)
    sub = lambda n: _ceil_to(n, 8)
    if compose:
        per = 4 * (sub(E) * lane(E) * 2 + lane(E) * 4)
    else:
        per = 4 * (sub(E) * lane(R) * 2 + lane(R) * 4 +
                   sub(R) * lane(E) * 2 + lane(E) * 4)
    return buffers * per


def _pick_batch_tile(B, S, E, H, bytes_budget, target_rows):
    """Largest Bt that (a) divides B, (b) leaves >=2 grid steps (both v7x
    TensorCores get work and the DMA pipeline has something to overlap),
    (c) fits the VMEM budget, (d) aims for `target_rows` MXU rows."""
    max_bt = max(1, B // 2)
    bt = min(max_bt, max(1, -(-target_rows // S)))
    while bt > 1 and (B % bt != 0 or _block_vmem_bytes(bt, S, E, H) > bytes_budget):
        bt -= 1
    return bt


# ---------------------------------------------------------------------------
# Parameter preparation
# ---------------------------------------------------------------------------
def _prepare_params(params, head_dim):
    """Fold the low-rank pairs (when profitable) and the 1/sqrt(Dh) attention
    scale into effective weights; cast matrices to bf16, keep biases f32."""
    E, R = params["wql"].shape
    scale = 1.0 / math.sqrt(head_dim)
    # Compose W_l @ W_h when one (rows,E)x(E,E) matmul is cheaper than two
    # lane-starved rank-R matmuls (MXU lanes fill in >=128 chunks).
    compose = E <= 2 * max(R, 128)
    flat = []
    for prefix, s in (("q", scale), ("k", 1.0), ("v", 1.0), ("o", 1.0)):
        wl, bl = params["w" + prefix + "l"], params["b" + prefix + "l"]
        wh, bh = params["w" + prefix + "h"], params["b" + prefix + "h"]
        if compose:
            w_eff = (wl @ wh) * s                     # (E, E), exact algebra
            b_eff = (bl @ wh + bh) * s                # (1, E)
            flat += [w_eff.astype(jnp.bfloat16), b_eff.astype(jnp.float32)]
        else:
            flat += [wl.astype(jnp.bfloat16), bl.astype(jnp.float32),
                     (wh * s).astype(jnp.bfloat16), (bh * s).astype(jnp.float32)]
    return compose, flat


# ---------------------------------------------------------------------------
# Wrapper
# ---------------------------------------------------------------------------
def lowrank_mha(query, key, value, params, num_heads):
    B, S, E = query.shape
    assert E % num_heads == 0, "embed_dim must be divisible by num_heads"
    # TODO(synk): pad S instead of requiring sublane alignment.
    assert S % 8 == 0, "seq length must be a multiple of 8 (sublane)"
    head_dim = E // num_heads
    rank = params["wql"].shape[1]

    compose, param_list = _prepare_params(params, head_dim)

    vmem_cap = _vmem_capacity_bytes()
    # Scoped VMEM limit: ~62% of physical (40 MiB on v7x's 64 MiB/TC), capped
    # at 64 MiB on the 128 MiB parts; leave headroom for compiler temporaries.
    vmem_limit = min(64 * 1024 * 1024, int(vmem_cap * 0.625))
    budget = vmem_limit // 2 - _weight_vmem_bytes(E, rank, compose)
    Bt = _pick_batch_tile(B, S, E, num_heads, budget, _target_rows())

    x_spec = pl.BlockSpec((Bt, S, E), lambda b: (b, 0, 0))

    def weight_spec(arr, single_buffer):
        nd = arr.ndim
        kwargs = {}
        if single_buffer:
            # Constant-index blocks gain nothing from double buffering; halve
            # their VMEM footprint (matters most inside v7x's 64 MiB VMEM).
            kwargs["pipeline_mode"] = pl.Buffered(1)
        return pl.BlockSpec(arr.shape, lambda b, nd=nd: (0,) * nd, **kwargs)

    kernel = functools.partial(_lowrank_mha_kernel, num_heads, head_dim, S,
                               not compose)

    def build(lane_dense, single_buffer_weights):
        if lane_dense:
            out_spec = pl.BlockSpec((Bt, S * E), lambda b: (b, 0))
            out_shape = jax.ShapeDtypeStruct((B, S * E), query.dtype)
        else:
            out_spec = pl.BlockSpec((Bt, S, E), lambda b: (b, 0, 0))
            out_shape = jax.ShapeDtypeStruct((B, S, E), query.dtype)
        in_specs = ([x_spec] * 3 +
                    [weight_spec(p, single_buffer_weights) for p in param_list])
        return pl.pallas_call(
            kernel,
            out_shape=out_shape,
            grid_spec=pltpu.PrefetchScalarGridSpec(
                num_scalar_prefetch=0,
                grid=(B // Bt,),
                in_specs=in_specs,
                out_specs=out_spec,
            ),
            compiler_params=pltpu.CompilerParams(
                dimension_semantics=("parallel",),
                vmem_limit_bytes=vmem_limit,
            ),
        )

    # E < 128 makes a (Bt,S,E) output store lane-masked; when the block can
    # form full (8,128) tiles we present a lane-dense (Bt, S*E) output slab
    # (full-width vst) and undo the flatten outside the kernel.  Both the
    # lane-dense store and the single-buffered weight specs depend on features
    # that vary across jax/Mosaic versions, so fall back gracefully if
    # lowering rejects them.
    lane_dense_ok = (E < 128) and (S * E) % 128 == 0 and Bt % 8 == 0
    configs = [(lane_dense_ok, True), (lane_dense_ok, False),
               (False, True), (False, False)]
    seen = set()
    last_err = None
    for lane_dense, single_buf in configs:
        if (lane_dense, single_buf) in seen:
            continue
        seen.add((lane_dense, single_buf))
        try:
            out = build(lane_dense, single_buf)(query, key, value, *param_list)
        except Exception as err:        # unsupported feature -> next config
            last_err = err
            continue
        return out.reshape(B, S, E) if lane_dense else out
    raise last_err


# ---------------------------------------------------------------------------
# Parameter init + pure-JAX reference
# ---------------------------------------------------------------------------
def init_params(key, embed_dim, rank):
    """Deterministic init matching the nn.Linear shapes (stored as W^T)."""
    params = {}
    keys = jax.random.split(key, 32)
    i = 0
    for prefix in ["q", "k", "v", "o"]:
        for suffix, fan_in, fan_out in [("l", embed_dim, rank),
                                        ("h", rank, embed_dim)]:
            bound = 1.0 / math.sqrt(fan_in)
            w = jax.random.uniform(keys[i], (fan_in, fan_out), jnp.float32,
                                   -bound, bound)          # = W^T of (out, in)
            b = jax.random.uniform(keys[i + 1], (1, fan_out), jnp.float32,
                                   -bound, bound)
            params["w" + prefix + suffix] = w
            params["b" + prefix + suffix] = b
            i += 2
    return params


def reference_forward(query, key, value, params, num_heads):
    """Pure-JAX f32 transcription of the PyTorch forward (masks=None, dropout=0)."""
    B, S, E = query.shape
    Dh = E // num_heads

    def lr(x, wl, bl, wh, bh):
        return (x @ wl + bl) @ wh + bh

    q = lr(query, params["wql"], params["bql"], params["wqh"], params["bqh"])
    k = lr(key, params["wkl"], params["bkl"], params["wkh"], params["bkh"])
    v = lr(value, params["wvl"], params["bvl"], params["wvh"], params["bvh"])
    q = q.reshape(B, S, num_heads, Dh).transpose(0, 2, 1, 3)
    k = k.reshape(B, S, num_heads, Dh).transpose(0, 2, 1, 3)
    v = v.reshape(B, S, num_heads, Dh).transpose(0, 2, 1, 3)
    scores = jnp.matmul(q, k.transpose(0, 1, 3, 2)) / math.sqrt(Dh)
    p = jax.nn.softmax(scores, axis=-1)
    ao = jnp.matmul(p, v)
    ao = ao.transpose(0, 2, 1, 3).reshape(B, S, E)
    return lr(ao, params["wol"], params["bol"], params["woh"], params["boh"])


if __name__ == "__main__":
    B, S, E, H, R = 2, 8, 32, 4, 8   # batch, seq, embed_dim, num_heads, rank

    root = jax.random.PRNGKey(0)
    kq, kk, kv, kp = jax.random.split(root, 4)
    query = jax.random.normal(kq, (B, S, E), jnp.float32)
    key_in = jax.random.normal(kk, (B, S, E), jnp.float32)
    value = jax.random.normal(kv, (B, S, E), jnp.float32)
    params = init_params(kp, E, R)

    out = lowrank_mha(query, key_in, value, params, H)
    out = jax.block_until_ready(out)

    ref = reference_forward(query, key_in, value, params, H)
    assert out.shape == (B, S, E)
    max_err = float(np.max(np.abs(np.asarray(out) - np.asarray(ref))))
    assert np.allclose(np.asarray(out), np.asarray(ref), atol=2e-2, rtol=2e-2), \
        f"Pallas output does not match reference (max abs err {max_err})"
    print("KERNEL_OK")
</pallas_src>

<mosaic_0001>
module attributes {stable_mosaic.version = 11 : i64} {
  func.func @_lowrank_mha_kernel(%arg0: i32, %arg1: memref<1x8x32xf32, #tpu.memory_space<vmem>>, %arg2: memref<1x8x32xf32, #tpu.memory_space<vmem>>, %arg3: memref<1x8x32xf32, #tpu.memory_space<vmem>>, %arg4: memref<32x32xbf16, #tpu.memory_space<vmem>>, %arg5: memref<1x32xf32, #tpu.memory_space<vmem>>, %arg6: memref<32x32xbf16, #tpu.memory_space<vmem>>, %arg7: memref<1x32xf32, #tpu.memory_space<vmem>>, %arg8: memref<32x32xbf16, #tpu.memory_space<vmem>>, %arg9: memref<1x32xf32, #tpu.memory_space<vmem>>, %arg10: memref<32x32xbf16, #tpu.memory_space<vmem>>, %arg11: memref<1x32xf32, #tpu.memory_space<vmem>>, %arg12: memref<1x8x32xf32, #tpu.memory_space<vmem>>) attributes {dimension_semantics = [#tpu.dimension_semantics<parallel>], iteration_bounds = array<i64: 2>, scalar_prefetch = 0 : i64, scratch_operands = 0 : i64, tpu.core_type = #tpu.core_type<tc>, window_params = [{transform_indices = @transform_0, window_bounds = array<i64: 1, 8, 32>}, {transform_indices = @transform_1, window_bounds = array<i64: 1, 8, 32>}, {transform_indices = @transform_2, window_bounds = array<i64: 1, 8, 32>}, {pipeline_mode = #tpu.pipeline_mode<synchronous>, transform_indices = @transform_3, window_bounds = array<i64: 32, 32>}, {pipeline_mode = #tpu.pipeline_mode<synchronous>, transform_indices = @transform_4, window_bounds = array<i64: 1, 32>}, {pipeline_mode = #tpu.pipeline_mode<synchronous>, transform_indices = @transform_5, window_bounds = array<i64: 32, 32>}, {pipeline_mode = #tpu.pipeline_mode<synchronous>, transform_indices = @transform_6, window_bounds = array<i64: 1, 32>}, {pipeline_mode = #tpu.pipeline_mode<synchronous>, transform_indices = @transform_7, window_bounds = array<i64: 32, 32>}, {pipeline_mode = #tpu.pipeline_mode<synchronous>, transform_indices = @transform_8, window_bounds = array<i64: 1, 32>}, {pipeline_mode = #tpu.pipeline_mode<synchronous>, transform_indices = @transform_9, window_bounds = array<i64: 32, 32>}, {pipeline_mode = #tpu.pipeline_mode<synchronous>, transform_indices = @transform_10, window_bounds = array<i64: 1, 32>}, {transform_indices = @transform_11, window_bounds = array<i64: 1, 8, 32>}]} {
    %c0 = arith.constant 0 : index
    %c0_0 = arith.constant 0 : index
    %c0_1 = arith.constant 0 : index
    %0 = vector.load %arg1[%c0, %c0_0, %c0_1] : memref<1x8x32xf32, #tpu.memory_space<vmem>>, vector<1x8x32xf32>
    %1 = vector.shape_cast %0 : vector<1x8x32xf32> to vector<8x32xf32>
    %c0_2 = arith.constant 0 : index
    %c0_3 = arith.constant 0 : index
    %c0_4 = arith.constant 0 : index
    %2 = vector.load %arg2[%c0_2, %c0_3, %c0_4] : memref<1x8x32xf32, #tpu.memory_space<vmem>>, vector<1x8x32xf32>
    %3 = vector.shape_cast %2 : vector<1x8x32xf32> to vector<8x32xf32>
    %c0_5 = arith.constant 0 : index
    %c0_6 = arith.constant 0 : index
    %c0_7 = arith.constant 0 : index
    %4 = vector.load %arg3[%c0_5, %c0_6, %c0_7] : memref<1x8x32xf32, #tpu.memory_space<vmem>>, vector<1x8x32xf32>
    %5 = vector.shape_cast %4 : vector<1x8x32xf32> to vector<8x32xf32>
    %6 = arith.truncf %1 : vector<8x32xf32> to vector<8x32xbf16>
    %c0_8 = arith.constant 0 : index
    %c0_9 = arith.constant 0 : index
    %7 = vector.load %arg4[%c0_8, %c0_9] : memref<32x32xbf16, #tpu.memory_space<vmem>>, vector<32x32xbf16>
    %cst = arith.constant dense<0.000000e+00> : vector<8x32xf32>
    %8 = tpu.matmul %6, %7, %cst {dimension_numbers = #tpu.dot_dimension_numbers<[1], [0], [0], [1], [0, 0, 1, 1], [], []>} : vector<8x32xbf16>, vector<32x32xbf16>, vector<8x32xf32> -> vector<8x32xf32>
    %c0_10 = arith.constant 0 : index
    %c0_11 = arith.constant 0 : index
    %9 = vector.load %arg5[%c0_10, %c0_11] : memref<1x32xf32, #tpu.memory_space<vmem>>, vector<1x32xf32>
    %10 = vector.broadcast %9 : vector<1x32xf32> to vector<8x32xf32>
    %11 = arith.addf %8, %10 : vector<8x32xf32>
    %12 = vector.shape_cast %11 : vector<8x32xf32> to vector<1x8x32xf32>
    %13 = arith.truncf %3 : vector<8x32xf32> to vector<8x32xbf16>
    %c0_12 = arith.constant 0 : index
    %c0_13 = arith.constant 0 : index
    %14 = vector.load %arg6[%c0_12, %c0_13] : memref<32x32xbf16, #tpu.memory_space<vmem>>, vector<32x32xbf16>
    %cst_14 = arith.constant dense<0.000000e+00> : vector<8x32xf32>
    %15 = tpu.matmul %13, %14, %cst_14 {dimension_numbers = #tpu.dot_dimension_numbers<[1], [0], [0], [1], [0, 0, 1, 1], [], []>} : vector<8x32xbf16>, vector<32x32xbf16>, vector<8x32xf32> -> vector<8x32xf32>
    %c0_15 = arith.constant 0 : index
    %c0_16 = arith.constant 0 : index
    %16 = vector.load %arg7[%c0_15, %c0_16] : memref<1x32xf32, #tpu.memory_space<vmem>>, vector<1x32xf32>
    %17 = vector.broadcast %16 : vector<1x32xf32> to vector<8x32xf32>
    %18 = arith.addf %15, %17 : vector<8x32xf32>
    %19 = vector.shape_cast %18 : vector<8x32xf32> to vector<1x8x32xf32>
    %20 = arith.truncf %5 : vector<8x32xf32> to vector<8x32xbf16>
    %c0_17 = arith.constant 0 : index
    %c0_18 = arith.constant 0 : index
    %21 = vector.load %arg8[%c0_17, %c0_18] : memref<32x32xbf16, #tpu.memory_space<vmem>>, vector<32x32xbf16>
    %cst_19 = arith.constant dense<0.000000e+00> : vector<8x32xf32>
    %22 = tpu.matmul %20, %21, %cst_19 {dimension_numbers = #tpu.dot_dimension_numbers<[1], [0], [0], [1], [0, 0, 1, 1], [], []>} : vector<8x32xbf16>, vector<32x32xbf16>, vector<8x32xf32> -> vector<8x32xf32>
    %c0_20 = arith.constant 0 : index
    %c0_21 = arith.constant 0 : index
    %23 = vector.load %arg9[%c0_20, %c0_21] : memref<1x32xf32, #tpu.memory_space<vmem>>, vector<1x32xf32>
    %24 = vector.broadcast %23 : vector<1x32xf32> to vector<8x32xf32>
    %25 = arith.addf %22, %24 : vector<8x32xf32>
    %26 = vector.shape_cast %25 : vector<8x32xf32> to vector<1x8x32xf32>
    %27 = vector.extract_strided_slice %12 {offsets = [0, 0, 0], sizes = [1, 8, 8], strides = [1, 1, 1]} : vector<1x8x32xf32> to vector<1x8x8xf32>
    %28 = vector.extract_strided_slice %12 {offsets = [0, 0, 8], sizes = [1, 8, 8], strides = [1, 1, 1]} : vector<1x8x32xf32> to vector<1x8x8xf32>
    %29 = vector.extract_strided_slice %12 {offsets = [0, 0, 16], sizes = [1, 8, 8], strides = [1, 1, 1]} : vector<1x8x32xf32> to vector<1x8x8xf32>
    %30 = vector.extract_strided_slice %12 {offsets = [0, 0, 24], sizes = [1, 8, 8], strides = [1, 1, 1]} : vector<1x8x32xf32> to vector<1x8x8xf32>
    %31 = tpu.concatenate %27, %28, %29, %30 in 0 : vector<1x8x8xf32>, vector<1x8x8xf32>, vector<1x8x8xf32>, vector<1x8x8xf32> -> vector<4x8x8xf32>
    %32 = arith.truncf %31 : vector<4x8x8xf32> to vector<4x8x8xbf16>
    %33 = vector.extract_strided_slice %19 {offsets = [0, 0, 0], sizes = [1, 8, 8], strides = [1, 1, 1]} : vector<1x8x32xf32> to vector<1x8x8xf32>
    %34 = vector.extract_strided_slice %19 {offsets = [0, 0, 8], sizes = [1, 8, 8], strides = [1, 1, 1]} : vector<1x8x32xf32> to vector<1x8x8xf32>
    %35 = vector.extract_strided_slice %19 {offsets = [0, 0, 16], sizes = [1, 8, 8], strides = [1, 1, 1]} : vector<1x8x32xf32> to vector<1x8x8xf32>
    %36 = vector.extract_strided_slice %19 {offsets = [0, 0, 24], sizes = [1, 8, 8], strides = [1, 1, 1]} : vector<1x8x32xf32> to vector<1x8x8xf32>
    %37 = tpu.concatenate %33, %34, %35, %36 in 0 : vector<1x8x8xf32>, vector<1x8x8xf32>, vector<1x8x8xf32>, vector<1x8x8xf32> -> vector<4x8x8xf32>
    %38 = arith.truncf %37 : vector<4x8x8xf32> to vector<4x8x8xbf16>
    %39 = vector.extract_strided_slice %26 {offsets = [0, 0, 0], sizes = [1, 8, 8], strides = [1, 1, 1]} : vector<1x8x32xf32> to vector<1x8x8xf32>
    %40 = vector.extract_strided_slice %26 {offsets = [0, 0, 8], sizes = [1, 8, 8], strides = [1, 1, 1]} : vector<1x8x32xf32> to vector<1x8x8xf32>
    %41 = vector.extract_strided_slice %26 {offsets = [0, 0, 16], sizes = [1, 8, 8], strides = [1, 1, 1]} : vector<1x8x32xf32> to vector<1x8x8xf32>
    %42 = vector.extract_strided_slice %26 {offsets = [0, 0, 24], sizes = [1, 8, 8], strides = [1, 1, 1]} : vector<1x8x32xf32> to vector<1x8x8xf32>
    %43 = tpu.concatenate %39, %40, %41, %42 in 0 : vector<1x8x8xf32>, vector<1x8x8xf32>, vector<1x8x8xf32>, vector<1x8x8xf32> -> vector<4x8x8xf32>
    %44 = arith.truncf %43 : vector<4x8x8xf32> to vector<4x8x8xbf16>
    "tpu.trace_start"() <{level = 10 : i32, message = "zqd,zkd->zqk"}> : () -> ()
    %cst_22 = arith.constant dense<0.000000e+00> : vector<4x8x8xf32>
    %45 = tpu.matmul %32, %38, %cst_22 {dimension_numbers = #tpu.dot_dimension_numbers<[2], [2], [1], [1], [0, 0, 0, 1, 1, 1], [0], [0]>} : vector<4x8x8xbf16>, vector<4x8x8xbf16>, vector<4x8x8xf32> -> vector<4x8x8xf32>
    "tpu.trace_stop"() : () -> ()
    %cst_23 = arith.constant dense<0xFF800000> : vector<4x8xf32>
    %46 = vector.multi_reduction <maximumf>, %45, %cst_23 [2] : vector<4x8x8xf32> to vector<4x8xf32>
    %47 = vector.shape_cast %46 : vector<4x8xf32> to vector<4x8x1xf32>
    %48 = vector.broadcast %47 : vector<4x8x1xf32> to vector<4x8x8xf32>
    %49 = arith.subf %45, %48 : vector<4x8x8xf32>
    %50 = math.exp %49 : vector<4x8x8xf32>
    %cst_24 = arith.constant dense<0.000000e+00> : vector<4x8xf32>
    %51 = vector.multi_reduction <add>, %50, %cst_24 [2] : vector<4x8x8xf32> to vector<4x8xf32>
    %52 = vector.shape_cast %51 : vector<4x8xf32> to vector<4x8x1xf32>
    %53 = tpu.reciprocal %52 {approx = true} : vector<4x8x1xf32> -> vector<4x8x1xf32>
    %54 = vector.broadcast %53 : vector<4x8x1xf32> to vector<4x8x8xf32>
    %55 = arith.mulf %50, %54 : vector<4x8x8xf32>
    %56 = arith.truncf %55 : vector<4x8x8xf32> to vector<4x8x8xbf16>
    "tpu.trace_start"() <{level = 10 : i32, message = "zqk,zkd->zqd"}> : () -> ()
    %cst_25 = arith.constant dense<0.000000e+00> : vector<4x8x8xf32>
    %57 = tpu.matmul %56, %44, %cst_25 {dimension_numbers = #tpu.dot_dimension_numbers<[2], [1], [1], [2], [0, 0, 0, 1, 1, 2], [0], [0]>} : vector<4x8x8xbf16>, vector<4x8x8xbf16>, vector<4x8x8xf32> -> vector<4x8x8xf32>
    "tpu.trace_stop"() : () -> ()
    %58 = vector.extract_strided_slice %57 {offsets = [0, 0, 0], sizes = [1, 8, 8], strides = [1, 1, 1]} : vector<4x8x8xf32> to vector<1x8x8xf32>
    %59 = vector.extract_strided_slice %57 {offsets = [1, 0, 0], sizes = [1, 8, 8], strides = [1, 1, 1]} : vector<4x8x8xf32> to vector<1x8x8xf32>
    %60 = vector.extract_strided_slice %57 {offsets = [2, 0, 0], sizes = [1, 8, 8], strides = [1, 1, 1]} : vector<4x8x8xf32> to vector<1x8x8xf32>
    %61 = vector.extract_strided_slice %57 {offsets = [3, 0, 0], sizes = [1, 8, 8], strides = [1, 1, 1]} : vector<4x8x8xf32> to vector<1x8x8xf32>
    %62 = tpu.concatenate %58, %59, %60, %61 in 2 : vector<1x8x8xf32>, vector<1x8x8xf32>, vector<1x8x8xf32>, vector<1x8x8xf32> -> vector<1x8x32xf32>
    %63 = vector.shape_cast %62 : vector<1x8x32xf32> to vector<8x32xf32>
    %64 = arith.truncf %63 : vector<8x32xf32> to vector<8x32xbf16>
    %c0_26 = arith.constant 0 : index
    %c0_27 = arith.constant 0 : index
    %65 = vector.load %arg10[%c0_26, %c0_27] : memref<32x32xbf16, #tpu.memory_space<vmem>>, vector<32x32xbf16>
    %cst_28 = arith.constant dense<0.000000e+00> : vector<8x32xf32>
    %66 = tpu.matmul %64, %65, %cst_28 {dimension_numbers = #tpu.dot_dimension_numbers<[1], [0], [0], [1], [0, 0, 1, 1], [], []>} : vector<8x32xbf16>, vector<32x32xbf16>, vector<8x32xf32> -> vector<8x32xf32>
    %c0_29 = arith.constant 0 : index
    %c0_30 = arith.constant 0 : index
    %67 = vector.load %arg11[%c0_29, %c0_30] : memref<1x32xf32, #tpu.memory_space<vmem>>, vector<1x32xf32>
    %68 = vector.broadcast %67 : vector<1x32xf32> to vector<8x32xf32>
    %69 = arith.addf %66, %68 : vector<8x32xf32>
    %70 = vector.shape_cast %69 : vector<8x32xf32> to vector<1x8x32xf32>
    %c0_31 = arith.constant 0 : index
    %c0_32 = arith.constant 0 : index
    %c0_33 = arith.constant 0 : index
    %71 = vector.load %arg12[%c0_31, %c0_32, %c0_33] : memref<1x8x32xf32, #tpu.memory_space<vmem>>, vector<1x8x32xf32>
    tpu.vector_store %arg12[%c0_31, %c0_32, %c0_33], %70 {strides = array<i32>} : memref<1x8x32xf32, #tpu.memory_space<vmem>>, vector<1x8x32xf32>,
    return
  }
  func.func @transform_0(%arg0: i32) -> (i32, i32, i32) {
    %c0_i32 = arith.constant 0 : i32
    %c0_i32_0 = arith.constant 0 : i32
    %c0_i32_1 = arith.constant 0 : i32
    return %arg0, %c0_i32, %c0_i32_0 : i32, i32, i32
  }
  func.func @transform_1(%arg0: i32) -> (i32, i32, i32) {
    %c0_i32 = arith.constant 0 : i32
    %c0_i32_0 = arith.constant 0 : i32
    %c0_i32_1 = arith.constant 0 : i32
    return %arg0, %c0_i32, %c0_i32_0 : i32, i32, i32
  }
  func.func @transform_2(%arg0: i32) -> (i32, i32, i32) {
    %c0_i32 = arith.constant 0 : i32
    %c0_i32_0 = arith.constant 0 : i32
    %c0_i32_1 = arith.constant 0 : i32
    return %arg0, %c0_i32, %c0_i32_0 : i32, i32, i32
  }
  func.func @transform_3(%arg0: i32) -> (i32, i32) {
    %c0_i32 = arith.constant 0 : i32
    %c0_i32_0 = arith.constant 0 : i32
    %c0_i32_1 = arith.constant 0 : i32
    return %c0_i32, %c0_i32_0 : i32, i32
  }
  func.func @transform_4(%arg0: i32) -> (i32, i32) {
    %c0_i32 = arith.constant 0 : i32
    %c0_i32_0 = arith.constant 0 : i32
    %c0_i32_1 = arith.constant 0 : i32
    return %c0_i32, %c0_i32_0 : i32, i32
  }
  func.func @transform_5(%arg0: i32) -> (i32, i32) {
    %c0_i32 = arith.constant 0 : i32
    %c0_i32_0 = arith.constant 0 : i32
    %c0_i32_1 = arith.constant 0 : i32
    return %c0_i32, %c0_i32_0 : i32, i32
  }
  func.func @transform_6(%arg0: i32) -> (i32, i32) {
    %c0_i32 = arith.constant 0 : i32
    %c0_i32_0 = arith.constant 0 : i32
    %c0_i32_1 = arith.constant 0 : i32
    return %c0_i32, %c0_i32_0 : i32, i32
  }
  func.func @transform_7(%arg0: i32) -> (i32, i32) {
    %c0_i32 = arith.constant 0 : i32
    %c0_i32_0 = arith.constant 0 : i32
    %c0_i32_1 = arith.constant 0 : i32
    return %c0_i32, %c0_i32_0 : i32, i32
  }
  func.func @transform_8(%arg0: i32) -> (i32, i32) {
    %c0_i32 = arith.constant 0 : i32
    %c0_i32_0 = arith.constant 0 : i32
    %c0_i32_1 = arith.constant 0 : i32
    return %c0_i32, %c0_i32_0 : i32, i32
  }
  func.func @transform_9(%arg0: i32) -> (i32, i32) {
    %c0_i32 = arith.constant 0 : i32
    %c0_i32_0 = arith.constant 0 : i32
    %c0_i32_1 = arith.constant 0 : i32
    return %c0_i32, %c0_i32_0 : i32, i32
  }
  func.func @transform_10(%arg0: i32) -> (i32, i32) {
    %c0_i32 = arith.constant 0 : i32
    %c0_i32_0 = arith.constant 0 : i32
    %c0_i32_1 = arith.constant 0 : i32
    return %c0_i32, %c0_i32_0 : i32, i32
  }
  func.func @transform_11(%arg0: i32) -> (i32, i32, i32) {
    %c0_i32 = arith.constant 0 : i32
    %c0_i32_0 = arith.constant 0 : i32
    %c0_i32_1 = arith.constant 0 : i32
    return %arg0, %c0_i32, %c0_i32_0 : i32, i32, i32
  }
}

module attributes {stable_mosaic.version = 11 : i64} {
  func.func @_lowrank_mha_kernel(%arg0: i32, %arg1: memref<1x8x32xf32, #tpu.memory_space<vmem>>, %arg2: memref<1x8x32xf32, #tpu.memory_space<vmem>>, %arg3: memref<1x8x32xf32, #tpu.memory_space<vmem>>, %arg4: memref<32x32xbf16, #tpu.memory_space<vmem>>, %arg5: memref<1x32xf32, #tpu.memory_space<vmem>>, %arg6: memref<32x32xbf16, #tpu.memory_space<vmem>>, %arg7: memref<1x32xf32, #tpu.memory_space<vmem>>, %arg8: memref<32x32xbf16, #tpu.memory_space<vmem>>, %arg9: memref<1x32xf32, #tpu.memory_space<vmem>>, %arg10: memref<32x32xbf16, #tpu.memory_space<vmem>>, %arg11: memref<1x32xf32, #tpu.memory_space<vmem>>, %arg12: memref<1x8x32xf32, #tpu.memory_space<vmem>>) attributes {dimension_semantics = [#tpu.dimension_semantics<parallel>], iteration_bounds = array<i64: 2>, scalar_prefetch = 0 : i64, scratch_operands = 0 : i64, tpu.core_type = #tpu.core_type<tc>, window_params = [{transform_indices = @transform_0, window_bounds = array<i64: 1, 8, 32>}, {transform_indices = @transform_1, window_bounds = array<i64: 1, 8, 32>}, {transform_indices = @transform_2, window_bounds = array<i64: 1, 8, 32>}, {pipeline_mode = #tpu.pipeline_mode<synchronous>, transform_indices = @transform_3, window_bounds = array<i64: 32, 32>}, {pipeline_mode = #tpu.pipeline_mode<synchronous>, transform_indices = @transform_4, window_bounds = array<i64: 1, 32>}, {pipeline_mode = #tpu.pipeline_mode<synchronous>, transform_indices = @transform_5, window_bounds = array<i64: 32, 32>}, {pipeline_mode = #tpu.pipeline_mode<synchronous>, transform_indices = @transform_6, window_bounds = array<i64: 1, 32>}, {pipeline_mode = #tpu.pipeline_mode<synchronous>, transform_indices = @transform_7, window_bounds = array<i64: 32, 32>}, {pipeline_mode = #tpu.pipeline_mode<synchronous>, transform_indices = @transform_8, window_bounds = array<i64: 1, 32>}, {pipeline_mode = #tpu.pipeline_mode<synchronous>, transform_indices = @transform_9, window_bounds = array<i64: 32, 32>}, {pipeline_mode = #tpu.pipeline_mode<synchronous>, transform_indices = @transform_10, window_bounds = array<i64: 1, 32>}, {transform_indices = @transform_11, window_bounds = array<i64: 1, 8, 32>}]} {
    %c0 = arith.constant 0 : index
    %c0_0 = arith.constant 0 : index
    %c0_1 = arith.constant 0 : index
    %0 = vector.load %arg1[%c0, %c0_0, %c0_1] : memref<1x8x32xf32, #tpu.memory_space<vmem>>, vector<1x8x32xf32>
    %1 = vector.shape_cast %0 : vector<1x8x32xf32> to vector<8x32xf32>
    %c0_2 = arith.constant 0 : index
    %c0_3 = arith.constant 0 : index
    %c0_4 = arith.constant 0 : index
    %2 = vector.load %arg2[%c0_2, %c0_3, %c0_4] : memref<1x8x32xf32, #tpu.memory_space<vmem>>, vector<1x8x32xf32>
    %3 = vector.shape_cast %2 : vector<1x8x32xf32> to vector<8x32xf32>
    %c0_5 = arith.constant 0 : index
    %c0_6 = arith.constant 0 : index
    %c0_7 = arith.constant 0 : index
    %4 = vector.load %arg3[%c0_5, %c0_6, %c0_7] : memref<1x8x32xf32, #tpu.memory_space<vmem>>, vector<1x8x32xf32>
    %5 = vector.shape_cast %4 : vector<1x8x32xf32> to vector<8x32xf32>
    %6 = arith.truncf %1 : vector<8x32xf32> to vector<8x32xbf16>
    %c0_8 = arith.constant 0 : index
    %c0_9 = arith.constant 0 : index
    %7 = vector.load %arg4[%c0_8, %c0_9] : memref<32x32xbf16, #tpu.memory_space<vmem>>, vector<32x32xbf16>
    %cst = arith.constant dense<0.000000e+00> : vector<8x32xf32>
    %8 = tpu.matmul %6, %7, %cst {dimension_numbers = #tpu.dot_dimension_numbers<[1], [0], [0], [1], [0, 0, 1, 1], [], []>} : vector<8x32xbf16>, vector<32x32xbf16>, vector<8x32xf32> -> vector<8x32xf32>
    %c0_10 = arith.constant 0 : index
    %c0_11 = arith.constant 0 : index
    %9 = vector.load %arg5[%c0_10, %c0_11] : memref<1x32xf32, #tpu.memory_space<vmem>>, vector<1x32xf32>
    %10 = vector.broadcast %9 : vector<1x32xf32> to vector<8x32xf32>
    %11 = arith.addf %8, %10 : vector<8x32xf32>
    %12 = vector.shape_cast %11 : vector<8x32xf32> to vector<1x8x32xf32>
    %13 = arith.truncf %3 : vector<8x32xf32> to vector<8x32xbf16>
    %c0_12 = arith.constant 0 : index
    %c0_13 = arith.constant 0 : index
    %14 = vector.load %arg6[%c0_12, %c0_13] : memref<32x32xbf16, #tpu.memory_space<vmem>>, vector<32x32xbf16>
    %cst_14 = arith.constant dense<0.000000e+00> : vector<8x32xf32>
    %15 = tpu.matmul %13, %14, %cst_14 {dimension_numbers = #tpu.dot_dimension_numbers<[1], [0], [0], [1], [0, 0, 1, 1], [], []>} : vector<8x32xbf16>, vector<32x32xbf16>, vector<8x32xf32> -> vector<8x32xf32>
    %c0_15 = arith.constant 0 : index
    %c0_16 = arith.constant 0 : index
    %16 = vector.load %arg7[%c0_15, %c0_16] : memref<1x32xf32, #tpu.memory_space<vmem>>, vector<1x32xf32>
    %17 = vector.broadcast %16 : vector<1x32xf32> to vector<8x32xf32>
    %18 = arith.addf %15, %17 : vector<8x32xf32>
    %19 = vector.shape_cast %18 : vector<8x32xf32> to vector<1x8x32xf32>
    %20 = arith.truncf %5 : vector<8x32xf32> to vector<8x32xbf16>
    %c0_17 = arith.constant 0 : index
    %c0_18 = arith.constant 0 : index
    %21 = vector.load %arg8[%c0_17, %c0_18] : memref<32x32xbf16, #tpu.memory_space<vmem>>, vector<32x32xbf16>
    %cst_19 = arith.constant dense<0.000000e+00> : vector<8x32xf32>
    %22 = tpu.matmul %20, %21, %cst_19 {dimension_numbers = #tpu.dot_dimension_numbers<[1], [0], [0], [1], [0, 0, 1, 1], [], []>} : vector<8x32xbf16>, vector<32x32xbf16>, vector<8x32xf32> -> vector<8x32xf32>
    %c0_20 = arith.constant 0 : index
    %c0_21 = arith.constant 0 : index
    %23 = vector.load %arg9[%c0_20, %c0_21] : memref<1x32xf32, #tpu.memory_space<vmem>>, vector<1x32xf32>
    %24 = vector.broadcast %23 : vector<1x32xf32> to vector<8x32xf32>
    %25 = arith.addf %22, %24 : vector<8x32xf32>
    %26 = vector.shape_cast %25 : vector<8x32xf32> to vector<1x8x32xf32>
    %27 = vector.extract_strided_slice %12 {offsets = [0, 0, 0], sizes = [1, 8, 8], strides = [1, 1, 1]} : vector<1x8x32xf32> to vector<1x8x8xf32>
    %28 = vector.extract_strided_slice %12 {offsets = [0, 0, 8], sizes = [1, 8, 8], strides = [1, 1, 1]} : vector<1x8x32xf32> to vector<1x8x8xf32>
    %29 = vector.extract_strided_slice %12 {offsets = [0, 0, 16], sizes = [1, 8, 8], strides = [1, 1, 1]} : vector<1x8x32xf32> to vector<1x8x8xf32>
    %30 = vector.extract_strided_slice %12 {offsets = [0, 0, 24], sizes = [1, 8, 8], strides = [1, 1, 1]} : vector<1x8x32xf32> to vector<1x8x8xf32>
    %31 = tpu.concatenate %27, %28, %29, %30 in 0 : vector<1x8x8xf32>, vector<1x8x8xf32>, vector<1x8x8xf32>, vector<1x8x8xf32> -> vector<4x8x8xf32>
    %32 = arith.truncf %31 : vector<4x8x8xf32> to vector<4x8x8xbf16>
    %33 = vector.extract_strided_slice %19 {offsets = [0, 0, 0], sizes = [1, 8, 8], strides = [1, 1, 1]} : vector<1x8x32xf32> to vector<1x8x8xf32>
    %34 = vector.extract_strided_slice %19 {offsets = [0, 0, 8], sizes = [1, 8, 8], strides = [1, 1, 1]} : vector<1x8x32xf32> to vector<1x8x8xf32>
    %35 = vector.extract_strided_slice %19 {offsets = [0, 0, 16], sizes = [1, 8, 8], strides = [1, 1, 1]} : vector<1x8x32xf32> to vector<1x8x8xf32>
    %36 = vector.extract_strided_slice %19 {offsets = [0, 0, 24], sizes = [1, 8, 8], strides = [1, 1, 1]} : vector<1x8x32xf32> to vector<1x8x8xf32>
    %37 = tpu.concatenate %33, %34, %35, %36 in 0 : vector<1x8x8xf32>, vector<1x8x8xf32>, vector<1x8x8xf32>, vector<1x8x8xf32> -> vector<4x8x8xf32>
    %38 = arith.truncf %37 : vector<4x8x8xf32> to vector<4x8x8xbf16>
    %39 = vector.extract_strided_slice %26 {offsets = [0, 0, 0], sizes = [1, 8, 8], strides = [1, 1, 1]} : vector<1x8x32xf32> to vector<1x8x8xf32>
    %40 = vector.extract_strided_slice %26 {offsets = [0, 0, 8], sizes = [1, 8, 8], strides = [1, 1, 1]} : vector<1x8x32xf32> to vector<1x8x8xf32>
    %41 = vector.extract_strided_slice %26 {offsets = [0, 0, 16], sizes = [1, 8, 8], strides = [1, 1, 1]} : vector<1x8x32xf32> to vector<1x8x8xf32>
    %42 = vector.extract_strided_slice %26 {offsets = [0, 0, 24], sizes = [1, 8, 8], strides = [1, 1, 1]} : vector<1x8x32xf32> to vector<1x8x8xf32>
    %43 = tpu.concatenate %39, %40, %41, %42 in 0 : vector<1x8x8xf32>, vector<1x8x8xf32>, vector<1x8x8xf32>, vector<1x8x8xf32> -> vector<4x8x8xf32>
    %44 = arith.truncf %43 : vector<4x8x8xf32> to vector<4x8x8xbf16>
    "tpu.trace_start"() <{level = 10 : i32, message = "zqd,zkd->zqk"}> : () -> ()
    %cst_22 = arith.constant dense<0.000000e+00> : vector<4x8x8xf32>
    %45 = tpu.matmul %32, %38, %cst_22 {dimension_numbers = #tpu.dot_dimension_numbers<[2], [2], [1], [1], [0, 0, 0, 1, 1, 1], [0], [0]>} : vector<4x8x8xbf16>, vector<4x8x8xbf16>, vector<4x8x8xf32> -> vector<4x8x8xf32>
    "tpu.trace_stop"() : () -> ()
    %cst_23 = arith.constant dense<0xFF800000> : vector<4x8xf32>
    %46 = vector.multi_reduction <maximumf>, %45, %cst_23 [2] : vector<4x8x8xf32> to vector<4x8xf32>
    %47 = vector.shape_cast %46 : vector<4x8xf32> to vector<4x8x1xf32>
    %48 = vector.broadcast %47 : vector<4x8x1xf32> to vector<4x8x8xf32>
    %49 = arith.subf %45, %48 : vector<4x8x8xf32>
    %50 = math.exp %49 : vector<4x8x8xf32>
    %cst_24 = arith.constant dense<0.000000e+00> : vector<4x8xf32>
    %51 = vector.multi_reduction <add>, %50, %cst_24 [2] : vector<4x8x8xf32> to vector<4x8xf32>
    %52 = vector.shape_cast %51 : vector<4x8xf32> to vector<4x8x1xf32>
    %53 = tpu.reciprocal %52 {approx = true} : vector<4x8x1xf32> -> vector<4x8x1xf32>
    %54 = vector.broadcast %53 : vector<4x8x1xf32> to vector<4x8x8xf32>
    %55 = arith.mulf %50, %54 : vector<4x8x8xf32>
    %56 = arith.truncf %55 : vector<4x8x8xf32> to vector<4x8x8xbf16>
    "tpu.trace_start"() <{level = 10 : i32, message = "zqk,zkd->zqd"}> : () -> ()
    %cst_25 = arith.constant dense<0.000000e+00> : vector<4x8x8xf32>
    %57 = tpu.matmul %56, %44, %cst_25 {dimension_numbers = #tpu.dot_dimension_numbers<[2], [1], [1], [2], [0, 0, 0, 1, 1, 2], [0], [0]>} : vector<4x8x8xbf16>, vector<4x8x8xbf16>, vector<4x8x8xf32> -> vector<4x8x8xf32>
    "tpu.trace_stop"() : () -> ()
    %58 = vector.extract_strided_slice %57 {offsets = [0, 0, 0], sizes = [1, 8, 8], strides = [1, 1, 1]} : vector<4x8x8xf32> to vector<1x8x8xf32>
    %59 = vector.extract_strided_slice %57 {offsets = [1, 0, 0], sizes = [1, 8, 8], strides = [1, 1, 1]} : vector<4x8x8xf32> to vector<1x8x8xf32>
    %60 = vector.extract_strided_slice %57 {offsets = [2, 0, 0], sizes = [1, 8, 8], strides = [1, 1, 1]} : vector<4x8x8xf32> to vector<1x8x8xf32>
    %61 = vector.extract_strided_slice %57 {offsets = [3, 0, 0], sizes = [1, 8, 8], strides = [1, 1, 1]} : vector<4x8x8xf32> to vector<1x8x8xf32>
    %62 = tpu.concatenate %58, %59, %60, %61 in 2 : vector<1x8x8xf32>, vector<1x8x8xf32>, vector<1x8x8xf32>, vector<1x8x8xf32> -> vector<1x8x32xf32>
    %63 = vector.shape_cast %62 : vector<1x8x32xf32> to vector<8x32xf32>
    %64 = arith.truncf %63 : vector<8x32xf32> to vector<8x32xbf16>
    %c0_26 = arith.constant 0 : index
    %c0_27 = arith.constant 0 : index
    %65 = vector.load %arg10[%c0_26, %c0_27] : memref<32x32xbf16, #tpu.memory_space<vmem>>, vector<32x32xbf16>
    %cst_28 = arith.constant dense<0.000000e+00> : vector<8x32xf32>
    %66 = tpu.matmul %64, %65, %cst_28 {dimension_numbers = #tpu.dot_dimension_numbers<[1], [0], [0], [1], [0, 0, 1, 1], [], []>} : vector<8x32xbf16>, vector<32x32xbf16>, vector<8x32xf32> -> vector<8x32xf32>
    %c0_29 = arith.constant 0 : index
    %c0_30 = arith.constant 0 : index
    %67 = vector.load %arg11[%c0_29, %c0_30] : memref<1x32xf32, #tpu.memory_space<vmem>>, vector<1x32xf32>
    %68 = vector.broadcast %67 : vector<1x32xf32> to vector<8x32xf32>
    %69 = arith.addf %66, %68 : vector<8x32xf32>
    %70 = vector.shape_cast %69 : vector<8x32xf32> to vector<1x8x32xf32>
    %c0_31 = arith.constant 0 : index
    %c0_32 = arith.constant 0 : index
    %c0_33 = arith.constant 0 : index
    %71 = vector.load %arg12[%c0_31, %c0_32, %c0_33] : memref<1x8x32xf32, #tpu.memory_space<vmem>>, vector<1x8x32xf32>
    tpu.vector_store %arg12[%c0_31, %c0_32, %c0_33], %70 {strides = array<i32>} : memref<1x8x32xf32, #tpu.memory_space<vmem>>, vector<1x8x32xf32>,
    return
  }
  func.func @transform_0(%arg0: i32) -> (i32, i32, i32) {
    %c0_i32 = arith.constant 0 : i32
    %c0_i32_0 = arith.constant 0 : i32
    %c0_i32_1 = arith.constant 0 : i32
    return %arg0, %c0_i32, %c0_i32_0 : i32, i32, i32
  }
  func.func @transform_1(%arg0: i32) -> (i32, i32, i32) {
    %c0_i32 = arith.constant 0 : i32
    %c0_i32_0 = arith.constant 0 : i32
    %c0_i32_1 = arith.constant 0 : i32
    return %arg0, %c0_i32, %c0_i32_0 : i32, i32, i32
  }
  func.func @transform_2(%arg0: i32) -> (i32, i32, i32) {
    %c0_i32 = arith.constant 0 : i32
    %c0_i32_0 = arith.constant 0 : i32
    %c0_i32_1 = arith.constant 0 : i32
    return %arg0, %c0_i32, %c0_i32_0 : i32, i32, i32
  }
  func.func @transform_3(%arg0: i32) -> (i32, i32) {
    %c0_i32 = arith.constant 0 : i32
    %c0_i32_0 = arith.constant 0 : i32
    %c0_i32_1 = arith.constant 0 : i32
    return %c0_i32, %c0_i32_0 : i32, i32
  }
  func.func @transform_4(%arg0: i32) -> (i32, i32) {
    %c0_i32 = arith.constant 0 : i32
    %c0_i32_0 = arith.constant 0 : i32
    %c0_i32_1 = arith.constant 0 : i32
    return %c0_i32, %c0_i32_0 : i32, i32
  }
  func.func @transform_5(%arg0: i32) -> (i32, i32) {
    %c0_i32 = arith.constant 0 : i32
    %c0_i32_0 = arith.constant 0 : i32
    %c0_i32_1 = arith.constant 0 : i32
    return %c0_i32, %c0_i32_0 : i32, i32
  }
  func.func @transform_6(%arg0: i32) -> (i32, i32) {
    %c0_i32 = arith.constant 0 : i32
    %c0_i32_0 = arith.constant 0 : i32
    %c0_i32_1 = arith.constant 0 : i32
    return %c0_i32, %c0_i32_0 : i32, i32
  }
  func.func @transform_7(%arg0: i32) -> (i32, i32) {
    %c0_i32 = arith.constant 0 : i32
    %c0_i32_0 = arith.constant 0 : i32
    %c0_i32_1 = arith.constant 0 : i32
    return %c0_i32, %c0_i32_0 : i32, i32
  }
  func.func @transform_8(%arg0: i32) -> (i32, i32) {
    %c0_i32 = arith.constant 0 : i32
    %c0_i32_0 = arith.constant 0 : i32
    %c0_i32_1 = arith.constant 0 : i32
    return %c0_i32, %c0_i32_0 : i32, i32
  }
  func.func @transform_9(%arg0: i32) -> (i32, i32) {
    %c0_i32 = arith.constant 0 : i32
    %c0_i32_0 = arith.constant 0 : i32
    %c0_i32_1 = arith.constant 0 : i32
    return %c0_i32, %c0_i32_0 : i32, i32
  }
  func.func @transform_10(%arg0: i32) -> (i32, i32) {
    %c0_i32 = arith.constant 0 : i32
    %c0_i32_0 = arith.constant 0 : i32
    %c0_i32_1 = arith.constant 0 : i32
    return %c0_i32, %c0_i32_0 : i32, i32
  }
  func.func @transform_11(%arg0: i32) -> (i32, i32, i32) {
    %c0_i32 = arith.constant 0 : i32
    %c0_i32_0 = arith.constant 0 : i32
    %c0_i32_1 = arith.constant 0 : i32
    return %arg0, %c0_i32, %c0_i32_0 : i32, i32, i32
  }
}

</mosaic_0001>

<bundles_post_ra>
// kernel: tpu_custom_call.1
= control target key start
LH: loop header
LB: loop body
LE: loop exit
PB: predicated region body
PF: predicated region fallthrough
CT: control target
= control target key end

     0   :  { %s2471_s0 = inlined_call_operand.hbm [shape: f32[2,8,32], index: 0, kind: input, shape index: {}]   ;;  %s2472_s1 = inlined_call_operand.hbm [shape: f32[2,8,32], index: 1, kind: input, shape index: {}]   ;;  %s2473_s2 = inlined_call_operand.hbm [shape: f32[2,8,32], index: 2, kind: input, shape index: {}]   ;;  %s2474_s3 = inlined_call_operand.hbm [shape: bf16[32,32], index: 3, kind: input, shape index: {}]   ;;  %s2475_s4 = inlined_call_operand.vmem [shape: f32[1,32], index: 4, kind: input, shape index: {}]   ;;  %s2476_s5 = inlined_call_operand.vmem [shape: bf16[32,32], index: 5, kind: input, shape index: {}]   ;;  %s2477_s6 = inlined_call_operand.vmem [shape: f32[1,32], index: 6, kind: input, shape index: {}]   ;;  %s2478_s7 = inlined_call_operand.hbm [shape: bf16[32,32], index: 7, kind: input, shape index: {}]   ;;  %s2479_s8 = inlined_call_operand.hbm [shape: f32[1,32], index: 8, kind: input, shape index: {}]   ;;  %s2480_s9 = inlined_call_operand.vmem [shape: bf16[32,32], index: 9, kind: input, shape index: {}]   ;;  %s2481_s10 = inlined_call_operand.vmem [shape: f32[1,32], index: 10, kind: input, shape index: {}]   ;;  %s2482_s11 = inlined_call_operand.hbm [shape: f32[2,8,32], index: 11, kind: output, shape index: {}]  }
   0x1   :  { %2507 = sst [smem:[#allocation25_spill]] %s2472_s1 }
   0x2   :  { %2508 = sst [smem:[#allocation26_spill]] %s2474_s3 }
   0x3   :  { %2509 = sst [smem:[#allocation27_spill]] %s2477_s6 }
   0x4   :  { %2510 = sst [smem:[#allocation28_spill]] %s2480_s9 }
   0x5   :  { %2511 = sst [smem:[#allocation29_spill]] %s2481_s10 }
   0x6   :  { %2512 = sst [smem:[#allocation30_spill]] %s2482_s11 }
   0x7   :  { %16 = vsyncpa [#allocation3], 0 }
   0x8   :  { %18 = vsyncpa [#allocation3 + $0x1], 0 }
   0x9   :  { %19 = vsyncpa [#allocation6], 0 }
   0xa   :  { %21 = vsyncpa [#allocation6 + $0x1], 0 }
   0xb   :  { %22 = vsyncpa [#allocation9], 0 }
   0xc   :  { %23 = vsyncpa [#allocation12], 0 }
   0xd   :  { %24 = vsyncpa [#allocation4], 0 }
   0xe   :  { %26 = vsyncpa [#allocation4 + $0x1], 0  ;;  %s2030_s17 = smov 0   ;;  %s2032_s18 = smov 0  }
   0xf   :  { %s2034_s19 = smov 0   ;;  %s2036_s20 = smov 0  }
  0x10 LB: > { %2513 = sst [smem:[#allocation19_spill]] %s1939_s17  ;;  %s2051_s21 = sadd.s32 4294967295, %s1951_s20   ;;  %s1951_s20 = sphi %s2036_s20, %s2555_s20   ;;  %s1947_s19 = sphi %s2034_s19, %s2559_s19   ;;  %s1943_s18 = sphi %s2032_s18, %s2558_s18   ;;  %s1939_s17 = sphi %s2030_s17, %s2557_s17  }
  0x11   : > { %2514 = sst [smem:[#allocation20_spill]] %s1951_s20  ;;  %s1422_s22 = sadd.s32 4294967294, %s1951_s20  }
  0x12   : > { %p52_p0 = scmp.ne.s32.totalorder %s1943_s18, %s1939_s17  ;;  %p2485_p1 = scmp.eq.s32.totalorder %s2051_s21, 0 }
  0x13   : > { %p302_p3 = scmp.eq.s32.totalorder %s1422_s22, 1  ;;  %p1423_p5 = scmp.ge.s32.totalorder %s1951_s20, 1 }
  0x14   : > { %p2060_p4 = por %p2485_p1, %p52_p0  ;;  %p309_p7 = scmp.lt.s32.totalorder %s1951_s20, 3 }
  0x15   : > { %p2065_p6 = por %p302_p3, %p52_p0  ;;  %s1953_s26 = smov [#allocation8]  }
  0x16   : > { %s2515_s23 = scalar_select %p2060_p4, 1, 0 }
  0x17   : > { %s2516_s24 = scalar_select %p2065_p6, 1, 0 }
  0x18   : > { %p2070_p8 = pnand %p1423_p5, %p309_p7  ;;  %s321_s27 = sshll.u32 %s1953_s26, 4  ;;  %s2074_s27 = int_to_ptr.vmem [resolvable:$true] %s321_s27 }
  0x19   : > { %2517 = sst [smem:[#allocation21_spill]] %s2516_s24  ;;  %s2086_s29 = sadd.s32 1, %s1951_s20  }
  0x1a   : > { %s2518_s25 = scalar_select %p2070_p8, 1, 0 }
  0x1b   : > { %p1598_p9 = pneg %p2070_p8  ;;  %2520 = sst [smem:[#allocation22_spill]] %s2086_s29 }
  0x1c   : > { %s39_s30 = sadd.s32 1, %s1947_s19  ;;  %s36_s12 = ssub.s32 %s1951_s20, %s2086_s29 }
  0x1d   : > { %p2081_p11 = pnand %p1598_p9, %p2485_p1  ;;  %s2521_s3 = sld [smem:[#allocation26_spill]] }
  0x1f   : > { %s2519_s28 = scalar_select %p2081_p11, 1, 0 }
  0x20   : > { %p2099_p13 = pneg %p2081_p11 }
  0x22   : > { %s2522_s26 = scalar_select %p2099_p13, 1, 0 }
  0x23   : > { %s1699_s15 = scalar_lea.hbm %s2521_s3, 256 }
  0x24   : > { %p1700_p12 = scmp.ne.s32.totalorder %s2521_s3, %s1699_s15  ;;  %p1706_p5 = scmp.lt.u32.totalorder %s1699_s15, %s2521_s3 }
  0x26   : > { %p1702_p0 = pnand %p2099_p13, %p1700_p12 }
  0x28   : > { %p1703_p3 = pneg %p1702_p0 }
  0x2a   : > { %p1708_p7 = pnand %p1706_p5, %p1703_p3 }
  0x2c   : > { %1711 = shalt.err (!%p1708_p7)
}
  0x2d   : > { %s1712_s13 = scalar_lea.vmem %s2074_s27, 256  ;;  %p1720_p2 = scmp.lt.s32.totalorder %s2074_s27, %s2074_s27 }
  0x2e   : > { %p1713_p9 = scmp.ne.s32.totalorder %s2074_s27, %s1712_s13  ;;  %p1721_p6 = scmp.lt.s32.totalorder %s1712_s13, %s1712_s13 }
  0x30   : > { %p1715_p10 = pnand %p1713_p9, %p2099_p13  ;;  %p1722_p12 = por %p1721_p6, %p1720_p2 }
  0x32   : > { %p1716_p1 = pneg %p1715_p10 }
  0x34   : > { %p1723_p0 = pnand %p1722_p12, %p1716_p1 }
  0x36   : > { %1726 = shalt.err (!%p1723_p0)
}
  0x37   : > { %s2489_s14 = smov 64   ;;  %s2490_s17 = smov 4  }
  0x38   : > { %1601 = dma.hbm_to_vmem [thread:$0]  (!%p2081_p11), %s2521_s3, 256, %s2074_s27, [#allocation9], %s2489_s14, %s2489_s14, %s2490_s17  }
  0x39   : > { %p37_p1 = scmp.eq.s32.totalorder %s36_s12, 0  ;;  %p46_p2 = scmp.ne.s32.totalorder %s1947_s19, %s1943_s18 }
  0x3a   : > { %p47_p6 = scmp.eq.s32.totalorder %s1951_s20, 0  ;;  %p1625_p10 = scmp.lt.s32.totalorder %s1951_s20, 2 }
  0x3b   : > { %s2128_s16 = scalar_select %p37_p1, %s1947_s19, %s39_s30  }
  0x3c   : > { %p48_p3 = por %p47_p6, %p46_p2  ;;  %p2524_p5 = scmp.eq.s32.totalorder %s2051_s21, 1 }
  0x3d   : > { %2523 = sst [smem:[#allocation23_spill]] %s2128_s16  ;;  %s2491_s13 = sand.u32 1, %s1947_s19  }
  0x3e   : > { %p2132_p7 = por %p2524_p5, %p46_p2  ;;  %s2138_s29 = sshll.u32 %s1951_s20, 7 }
  0x3f   : > { %s2142_s11 = sshll.u32 %s2491_s13, 3  ;;  %p2144_p9 = pnand %p1625_p10, %p48_p3 }
  0x40   : > { %s2525_s22 = scalar_select %p2132_p7, 1, 0 }
  0x41   : > { %s2527_s27 = scalar_select %p2144_p9, 1, 0 }
  0x42   : > { %2526 = sst [smem:[#allocation24_spill]] %s2525_s22  ;;  %s392_s30 = sand.u32 1, %s1951_s20  }
  0x43   : > { %s2528_s1 = sld [smem:[#allocation25_spill]]  ;;  %s396_s14 = scalar_lea.vmem [#allocation5], %s2142_s11 }
  0x44   : > { %s403_s17 = sshll.u32 %s396_s14, 4  ;;  %s2158_s13 = scalar_lea.sflag [#allocation6], %s392_s30  ;;  %s2156_s17 = int_to_ptr.vmem [resolvable:$true] %s403_s17 }
  0x45   : > { %p2164_p0 = pneg %p2144_p9 }
  0x47   : > { %s2529_s16 = scalar_select %p2164_p0, 1, 0 }
  0x49   : > { %s2153_s15 = scalar_lea.hbm %s2528_s1, %s2138_s29  ;;  %s1732_s20 = scalar_lea.hbm %s2528_s1, 256 }
  0x4a   : > { %s1727_s3 = scalar_lea.hbm %s2153_s15, 128  ;;  %p1733_p6 = scmp.lt.u32.totalorder %s2153_s15, %s2528_s1 }
  0x4b   : > { %p1728_p12 = scmp.ne.s32.totalorder %s2153_s15, %s1727_s3  ;;  %p1734_p10 = scmp.lt.u32.totalorder %s1732_s20, %s1727_s3 }
  0x4c   : > { %p1736_p5 = scmp.lt.u32.totalorder %s1727_s3, %s2153_s15 }
  0x4d   : > { %p1730_p1 = pnand %p2164_p0, %p1728_p12  ;;  %p1735_p3 = por %p1734_p10, %p1733_p6 }
  0x4f   : > { %p1731_p2 = pneg %p1730_p1  ;;  %p1737_p7 = por %p1736_p5, %p1735_p3 }
  0x51   : > { %p1738_p4 = pnand %p1737_p7, %p1731_p2 }
  0x53   : > { %1741 = shalt.err (!%p1738_p4)
}
  0x54   : > { %s1742_s30 = scalar_lea.vmem %s2156_s17, 128  ;;  %s1956_s12 = smov [#allocation5]  }
  0x55   : > { %p1743_p12 = scmp.ne.s32.totalorder %s2156_s17, %s1742_s30  ;;  %s1747_s24 = sshll.u32 %s1956_s12, 4  ;;  %s1748_s24 = int_to_ptr.vmem [resolvable:$false] %s1747_s24 }
  0x56   : > { %s1749_s22 = scalar_lea.vmem %s1748_s24, 256  ;;  %p1750_p11 = scmp.lt.s32.totalorder %s2156_s17, %s1748_s24 }
  0x57   : > { %p1745_p1 = pnand %p1743_p12, %p2164_p0  ;;  %p1751_p13 = scmp.lt.s32.totalorder %s1749_s22, %s1742_s30 }
  0x59   : > { %p1746_p8 = pneg %p1745_p1  ;;  %p1752_p6 = por %p1751_p13, %p1750_p11 }
  0x5b   : > { %p1753_p10 = pnand %p1752_p6, %p1746_p8 }
  0x5d   : > { %1756 = shalt.err (!%p1753_p10)
}
  0x5e   : > { %1614 = dma.hbm_to_vmem [thread:$0]  (!%p2144_p9), %s2153_s15, 128, %s2156_s17, %s2158_s13  }
  0x5f   : > { %s1957_s3 = smov [#allocation10]   ;;  %s1958_s14 = smov [#allocation11]  }
  0x60   : > { %s343_s20 = sshll.u32 %s1957_s3, 4  ;;  %s357_s1 = sshll.u32 %s1958_s14, 4  ;;  %s344_s20 = int_to_ptr.vmem [resolvable:$true] %s343_s20  ;;  %s358_s1 = int_to_ptr.vmem [resolvable:$true] %s357_s1 }
  0x61   : > { %s1757_s24 = scalar_lea.hbm %s2478_s7, 256  ;;  %p2530_p8 = scmp.ne.s32.totalorder %s2522_s26, 0 }
  0x62   : > { %p1758_p4 = scmp.ne.s32.totalorder %s2478_s7, %s1757_s24  ;;  %p1764_p7 = scmp.lt.u32.totalorder %s1757_s24, %s2478_s7 }
  0x64   : > { %p1760_p11 = pnand %p1758_p4, %p2530_p8 }
  0x66   : > { %p1761_p13 = pneg %p1760_p11 }
  0x68   : > { %p1766_p2 = pnand %p1764_p7, %p1761_p13 }
  0x6a   : > { %1769 = shalt.err (!%p1766_p2)
}
  0x6b   : > { %s1770_s17 = scalar_lea.vmem %s344_s20, 256  ;;  %p1778_p1 = scmp.lt.s32.totalorder %s344_s20, %s344_s20 }
  0x6c   : > { %p1771_p3 = scmp.ne.s32.totalorder %s344_s20, %s1770_s17  ;;  %p1779_p6 = scmp.lt.s32.totalorder %s1770_s17, %s1770_s17 }
  0x6e   : > { %p1773_p5 = pnand %p1771_p3, %p2530_p8  ;;  %p1780_p10 = por %p1779_p6, %p1778_p1 }
  0x70   : > { %p1774_p12 = pneg %p1773_p5 }
  0x72   : > { %p1781_p9 = pnand %p1780_p10, %p1774_p12 }
  0x74   : > { %1784 = shalt.err (!%p1781_p9)
}
  0x75   : > { %p2531_p4 = scmp.ne.s32.totalorder %s2519_s28, 0  ;;  %s2532_s10 = smov 4  }
  0x76   : > { %s2533_s15 = smov 64   ;;  %s1785_s12 = scalar_lea.hbm %s2479_s8, 16 }
  0x77   : > { %1604 = dma.hbm_to_vmem [thread:$0]  (!%p2531_p4), %s2478_s7, 256, %s344_s20, [#allocation9], %s2533_s15, %s2533_s15, %s2532_s10  }
  0x78   : > { %p1786_p11 = scmp.ne.s32.totalorder %s2479_s8, %s1785_s12  ;;  %p1792_p7 = scmp.lt.u32.totalorder %s1785_s12, %s2479_s8 }
  0x7a   : > { %p1788_p9 = pnand %p1786_p11, %p2530_p8 }
  0x7c   : > { %p1789_p13 = pneg %p1788_p9 }
  0x7e   : > { %p1794_p2 = pnand %p1792_p7, %p1789_p13 }
  0x80   : > { %1797 = shalt.err (!%p1794_p2)
}
  0x81   : > { %s1798_s6 = scalar_lea.vmem %s358_s1, 16  ;;  %s1805_s20 = scalar_lea.vmem %s358_s1, 32 }
  0x82   : > { %p1799_p3 = scmp.ne.s32.totalorder %s358_s1, %s1798_s6  ;;  %p1806_p1 = scmp.lt.s32.totalorder %s358_s1, %s358_s1 }
  0x83   : > { %p1807_p6 = scmp.lt.s32.totalorder %s1805_s20, %s1798_s6 }
  0x84   : > { %p1801_p5 = pnand %p1799_p3, %p2530_p8 }
  0x85   : > { %p1808_p10 = por %p1807_p6, %p1806_p1 }
  0x86   : > { %p1802_p12 = pneg %p1801_p5 }
  0x88   : > { %p1809_p0 = pnand %p1808_p10, %p1802_p12 }
  0x8a   : > { %1812 = shalt.err (!%p1809_p0)
}
  0x8b   : > { %1607 = dma.hbm_to_vmem [thread:$0]  (!%p2531_p4), %s2479_s8, 16, %s358_s1, [#allocation12]  }
  0x8c   : > { %s2231_s3 = scalar_lea.hbm %s2471_s0, %s2138_s29  ;;  %s378_s14 = scalar_lea.vmem [#allocation2], %s2142_s11 }
  0x8d   : > { %s385_s28 = sshll.u32 %s378_s14, 4  ;;  %s2240_s30 = scalar_lea.hbm %s2473_s2, %s2138_s29  ;;  %s2234_s28 = int_to_ptr.vmem [resolvable:$true] %s385_s28 }
  0x8e   : > { %s2534_s22 = sand.u32 1, %s1947_s19   ;;  %s1813_s17 = scalar_lea.hbm %s2231_s3, 128 }
  0x8f   : > { %s375_s1 = scalar_lea.sflag [#allocation3], %s2534_s22  ;;  %p1814_p0 = scmp.ne.s32.totalorder %s2231_s3, %s1813_s17 }
  0x90   : > { %p2535_p8 = scmp.ne.s32.totalorder %s2529_s16, 0  ;;  %s1818_s10 = scalar_lea.hbm %s2471_s0, 256 }
  0x91   : > { %p1819_p9 = scmp.lt.u32.totalorder %s2231_s3, %s2471_s0  ;;  %p1820_p13 = scmp.lt.u32.totalorder %s1818_s10, %s1813_s17 }
  0x92   : > { %p1816_p4 = pnand %p1814_p0, %p2535_p8  ;;  %p1822_p2 = scmp.lt.u32.totalorder %s1813_s17, %s2231_s3 }
  0x93   : > { %p1821_p7 = por %p1820_p13, %p1819_p9 }
  0x94   : > { %p1817_p11 = pneg %p1816_p4 }
  0x95   : > { %p1823_p3 = por %p1822_p2, %p1821_p7 }
  0x97   : > { %p1824_p5 = pnand %p1823_p3, %p1817_p11 }
  0x99   : > { %1827 = shalt.err (!%p1824_p5)
}
  0x9a   : > { %s1828_s29 = scalar_lea.vmem %s2234_s28, 128  ;;  %s1959_s9 = smov [#allocation2]  }
  0x9b   : > { %p1829_p12 = scmp.ne.s32.totalorder %s2234_s28, %s1828_s29  ;;  %s1833_s14 = sshll.u32 %s1959_s9, 4  ;;  %s1834_s14 = int_to_ptr.vmem [resolvable:$false] %s1833_s14 }
  0x9c   : > { %s1835_s12 = scalar_lea.vmem %s1834_s14, 256  ;;  %p1836_p10 = scmp.lt.s32.totalorder %s2234_s28, %s1834_s14 }
  0x9d   : > { %p1831_p1 = pnand %p1829_p12, %p2535_p8  ;;  %p1837_p0 = scmp.lt.s32.totalorder %s1835_s12, %s1828_s29 }
  0x9f   : > { %p1832_p6 = pneg %p1831_p1  ;;  %p1838_p4 = por %p1837_p0, %p1836_p10 }
  0xa1   : > { %p1839_p9 = pnand %p1838_p4, %p1832_p6 }
  0xa3   : > { %1842 = shalt.err (!%p1839_p9)
}
  0xa4   : > { %p2536_p11 = scmp.ne.s32.totalorder %s2527_s27, 0  ;;  %s414_s24 = scalar_lea.vmem [#allocation7], %s2142_s11 }
  0xa5   : > { %s421_s22 = sshll.u32 %s414_s24, 4  ;;  %s1843_s17 = scalar_lea.hbm %s2240_s30, 128  ;;  %s422_s22 = int_to_ptr.vmem [resolvable:$true] %s421_s22 }
  0xa6   : > { %1611 = dma.hbm_to_vmem [thread:$0]  (!%p2536_p11), %s2231_s3, 128, %s2234_s28, %s375_s1  }
  0xa7   : > { %p1844_p13 = scmp.ne.s32.totalorder %s2240_s30, %s1843_s17  ;;  %s1848_s10 = scalar_lea.hbm %s2473_s2, 256 }
  0xa8   : > { %p1849_p3 = scmp.lt.u32.totalorder %s2240_s30, %s2473_s2  ;;  %p1850_p5 = scmp.lt.u32.totalorder %s1848_s10, %s1843_s17 }
  0xa9   : > { %p1846_p7 = pnand %p1844_p13, %p2535_p8  ;;  %p1852_p1 = scmp.lt.u32.totalorder %s1843_s17, %s2240_s30 }
  0xaa   : > { %p1851_p12 = por %p1850_p5, %p1849_p3 }
  0xab   : > { %p1847_p2 = pneg %p1846_p7 }
  0xac   : > { %p1853_p6 = por %p1852_p1, %p1851_p12 }
  0xae   : > { %p1854_p10 = pnand %p1853_p6, %p1847_p2 }
  0xb0   : > { %1857 = shalt.err (!%p1854_p10)
}
  0xb1   : > { %s1858_s11 = scalar_lea.vmem %s422_s22, 128  ;;  %s1960_s3 = smov [#allocation7]  }
  0xb2   : > { %p1859_p0 = scmp.ne.s32.totalorder %s422_s22, %s1858_s11  ;;  %s1863_s28 = sshll.u32 %s1960_s3, 4  ;;  %s1864_s28 = int_to_ptr.vmem [resolvable:$false] %s1863_s28 }
  0xb3   : > { %s1865_s1 = scalar_lea.vmem %s1864_s28, 256  ;;  %p1866_p13 = scmp.lt.s32.totalorder %s422_s22, %s1864_s28 }
  0xb4   : > { %p1861_p4 = pnand %p1859_p0, %p2535_p8  ;;  %p1867_p7 = scmp.lt.s32.totalorder %s1865_s1, %s1858_s11 }
  0xb6   : > { %p1862_p9 = pneg %p1861_p4  ;;  %p1868_p11 = por %p1867_p7, %p1866_p13 }
  0xb8   : > { %p1869_p3 = pnand %p1868_p11, %p1862_p9 }
  0xba   : > { %1872 = shalt.err (!%p1869_p3)
}
  0xbb   : > { %p2537_p5 = scmp.ne.s32.totalorder %s2527_s27, 0  ;;  %p2538_p2 = scmp.ne.s32.totalorder %s2518_s25, 0 }
  0xbc   : > { %s2287_s16 = sand.u32 (!%p2538_p2), 1, %s1943_s18   ;;  %p2539_p8 = scmp.ne.s32.totalorder (!%p2538_p2), %s2515_s23, 0 }
  0xbd   : > { %1617 = dma.hbm_to_vmem [thread:$0]  (!%p2537_p5), %s2240_s30, 128, %s422_s22, %s2158_s13  }
  0xbe   : > { %430 = sbr.rel (%p2538_p2) target bundleno = 1650 (0x672), region = 64  ;;  %s2290_s29 = sshll.u32 (!%p2538_p2), %s2287_s16, 3 }
  0xbf   : > { %s433_s9 = scalar_lea.sflag (!%p2538_p2), [#allocation3], %s2287_s16  ;;  %s436_s14 = scalar_lea.vmem (!%p2538_p2), [#allocation2], %s2290_s29 }
  0xc5   : > { %1918 = dma.done.wait (%p2539_p8), %s433_s9, 128  }
  0xc6   : > { %1920 = vsyncadd (%p2539_p8), %s433_s9, 4294967168  ;;  %s441_s25 = sand.u32 1, %s2051_s21   ;;  %s445_s27 = scalar_lea.vmem [#allocation5], %s2290_s29 }
  0xc7   : > { %s442_s13 = scalar_lea.sflag [#allocation6], %s441_s25 }
  0xc8   : > { %1922 = dma.done.wait (%p2539_p8), %s442_s13, 256  }
  0xc9   : > { %1924 = vsyncadd (%p2539_p8), %s442_s13, 4294967040  ;;  %s454_s30 = scalar_lea.vmem [#allocation7], %s2290_s29  ;;  %p2540_p11 = scmp.eq.s32.totalorder %s2051_s21, 0 }
  0xcb   : > { %1926 = dma.done.wait (%p2540_p11), [#allocation9], 512   ;;  %p2541_p12 = pmov %p2540_p11 }
  0xcc   : > { %p2542_p1 = pmov %p2540_p11 }
  0xcd   : > { %1928 = vsyncadd (%p2541_p12), [#allocation9], 4294966784 }
  0xce   : > { %1930 = dma.done.wait (%p2542_p1), [#allocation12], 16   ;;  %p2543_p6 = pmov %p2542_p1 }
  0xcf   : > { %v1961_v0 = vmov 0.0   ;;  %vm1962_vm0 = vmmov 0   ;;  %v1675_v1 = vld [vmem:[#allocation8] sm:$0xff]   ;;  %v1676_v2 = vld [vmem:[%s2476_s5] sm:$0xff]   ;;  %v1677_v3 = vld [vmem:[#allocation8 + $0x8] sm:$0xff]   ;;  %vm543_vm1 = vcmask 261120  }
  0xd0   : > { %1932 = vsyncadd (%p2543_p6), [#allocation12], 4294967280  ;;  %1498 = vmatprep.subr.bf16.mxu0 %v1961_v0  ;;  %1506 = vmatprep.subr.bf16.mxu1 %v1961_v0  ;;  %v1678_v4 = vld [vmem:[%s2476_s5 + $0x8] sm:$0xff]   ;;  %v517_v6 = vld [vmem:[%s445_s27] sm:$0xff]  ;;  %s2544_s15 = sld [smem:[#allocation27_spill]]  ;;  %s1963_s26 = smov 120  }
  0xd1   : > { %1502 = vmatprep.mubr.msk.bf16.mxu0 %vm1962_vm0, %v1961_v0  ;;  %1510 = vmatprep.mubr.msk.bf16.mxu1 %vm1962_vm0, %v1961_v0  ;;  %v516_v5 = vld [vmem:[%s436_s14] sm:$0xff]  ;;  %v587_v8 = vpack.c.bf16 %v517_v6, %v517_v6  ;;  %vm763_vm2 = vcmask 64512   ;;  %s1964_s11 = smov 104   ;;  %s1965_s3 = smov 112   ;;  %v1450_v43 = vld [vmem:[#allocation11] ss:$0 sm:$0xff] }
  0xd2   : > { %1499 = vmatpush3.bf16.msra.mxu0 %v1675_v1  ;;  %1507 = vmatpush3.bf16.msra.mxu1 %v1676_v2  ;;  %v519_v7 = vpack.c.bf16 %v516_v5, %v516_v5  ;;  %v1679_v9 = vld [vmem:[#allocation10] sm:$0xff]   ;;  %v1680_v10 = vld [vmem:[#allocation10 + $0x8] sm:$0xff]   ;;  %vm999_vm3 = vcmask 1043456   ;;  %s2545_s9 = sld [smem:[#allocation28_spill]]  ;;  %s1966_s13 = smov 8   ;;  %vm1194_vm4 = vcmask 130048  }
  0xd3   : > { %1500 = vmatprep.subr.bf16.mxu0 %v1961_v0  ;;  %1508 = vmatprep.subr.bf16.mxu1 %v1961_v0  ;;  %v518_v11 = vld [vmem:[%s454_s30] sm:$0xff]  ;;  %s1967_s27 = smov 16   ;;  %s1968_s30 = smov 24   ;;  %vm1196_vm5 = vcmask 195584  }
  0xd4   : > { %v654_v12 = vpack.c.bf16 %v518_v11, %v518_v11  ;;  %v1442_v13 = vld [vmem:[%s2475_s4] ss:$0 sm:$0xff]  ;;  %s2546_s24 = sld [smem:[#allocation29_spill]]  ;;  %s2547_s22 = sld [smem:[#allocation24_spill]] }
  0xd5   : > { %s1467_s17 = sshll.u32 %s2051_s21, 7  ;;  %s514_s6 = scalar_lea.vmem [#allocation13], %s2290_s29 }
  0xd6   : > { %1501 = vmatpush3.bf16.msra.mxu0 %v1677_v3  ;;  %1509 = vmatpush3.bf16.msra.mxu1 %v1678_v4  ;;  %v1446_v14 = vld [vmem:[%s2544_s15] ss:$0 sm:$0xff]  ;;  %s1280_s20 = sshll.u32 %s514_s6, 4  ;;  %s1267_s21 = scalar_lea.sflag [#allocation4], %s2287_s16  ;;  %s2428_s20 = int_to_ptr.vmem [resolvable:$true] %s1280_s20 }
  0xd7   : > { %1514 = vmatprep.subr.bf16.mxu0 %v1961_v0  ;;  %1522 = vmatprep.subr.bf16.mxu1 %v1961_v0  ;;  %s1873_s29 = scalar_lea.vmem %s2428_s20, 128 }
  0xd8   : > { %p1874_p10 = scmp.ne.s32.totalorder %s2428_s20, %s1873_s29 }
  0xd9   : > { %1503 = vmatmul.mubr.msk.bf16.vlgmr.msra.gmra.mrb[0].mxu0 %vm543_vm1, %v519_v7  ;;  %1511 = vmatmul.mubr.msk.bf16.vlgmr.msra.gmra.mrb[0].mxu1 %vm543_vm1, %v587_v8 }
  0xda   : > { %1518 = vmatprep.mubr.msk.bf16.mxu0 %vm1962_vm0, %v1961_v0  ;;  %1524 = vmatprep.mubr.msk.bf16.mxu1 %vm1962_vm0, %v1961_v0  ;;  %p2549_p0 = scmp.ne.s32.totalorder %s2547_s22, 0 }
  0xdb   : > { %1515 = vmatpush3.bf16.msra.mxu0 %v1679_v9 }
  0xdc   : > { %1516 = vmatprep.subr.bf16.mxu0 %v1961_v0  ;;  %p1875_p4 = pnand %p1874_p10, %p2549_p0 }
  0xde   : > { %p1876_p9 = pneg %p1875_p4 }
  0xdf   : > { %1517 = vmatpush3.bf16.msra.mxu0 %v1680_v10 }
  0xe0   : > { %1528 = vmatprep.subr.bf16.mxu0 %v1961_v0 }
  0xe2   : > { %1519 = vmatmul.mubr.msk.bf16.vlgmr.msra.gmra.mrb[4].mxu0 %vm543_vm1, %v654_v12 }
  0xe3   : > { %1530 = vmatprep.mubr.msk.bf16.mxu0 %vm1962_vm0, %v1961_v0 }
 0x1ac   : > { %v581_v15 = vpop.f32.mrb[0].mxu0  ;;  %v648_v17 = vpop.f32.mrb[0].mxu1 }
 0x1ad   : > { %v582_v16 = vadd.f32 %v1442_v13, %v581_v15  ;;  %v1504_v18 = vpop.f32.mrb[1].mxu0  ;;  %v649_v19 = vadd.f32 %v1446_v14, %v648_v17  ;;  %v1512_v20 = vpop.f32.mrb[1].mxu1 }
 0x1ae   : > { %v584_v21 = vpop.f32.mrb[2].mxu0  ;;  %v651_v22 = vpop.f32.mrb[2].mxu1 }
 0x1af   : > { %722 = vrot.lane.b32.xlu1 %v582_v16, %s1963_s26  ;;  %v1505_v23 = vpop.f32.mrb[3].mxu0  ;;  %736 = vrot.lane.b32.xlu0 %v649_v19, %s1963_s26  ;;  %v1513_v24 = vpop.f32.mrb[3].mxu1  ;;  %v745_v25 = vpack.c.bf16 %v649_v19, %v649_v19  ;;  %v731_v27 = vpack.c.bf16 %v582_v16, %v582_v16 }
 0x1b1   : > { %v768_v26 = vsel %vm763_vm2, %v745_v25, 0 }
 0x1b2   : > { %1523 = vmatpush3.bf16.xpose.msra.mxu1 %v768_v26 }
 0x1b3   : > { %742 = vrot.lane.b32.xlu1 %v649_v19, %s1964_s11  ;;  %739 = vrot.lane.b32.xlu0 %v649_v19, %s1965_s3 }
 0x1b4   : > { %1534 = vmatprep.subr.bf16.mxu1 %v1961_v0 }
 0x1b5   : > { %v715_v44 = vpop.f32.mrb[4].mxu0 }
 0x1b6   : > { %v2374_v45 = vadd.f32 %v1450_v43, %v715_v44  ;;  %v1520_v46 = vpop.f32.mrb[5].mxu0 }
 0x1b7   : > { %728 = vrot.lane.b32.xlu1 %v582_v16, %s1964_s11  ;;  %725 = vrot.lane.b32.xlu0 %v582_v16, %s1965_s3  ;;  %v718_v47 = vpop.f32.mrb[6].mxu0 }
 0x1b8   : > { %v1521_v48 = vpop.f32.mrb[7].mxu0  ;;  %v759_v49 = vpack.c.bf16 %v2374_v45, %v2374_v45 }
 0x1b9   : > { %1525 = vmatmul.mubr.msk.bf16.vlgmr.msra.gmra.mrb[4].mxu1 %vm763_vm2, %v731_v27 }
 0x1ba   : > { %1536 = vmatprep.mubr.msk.bf16.mxu1 %vm1962_vm0, %v1961_v0  ;;  %v1001_v50 = vsel %vm999_vm3, %v759_v49, 0 }
 0x221   : > { %v723_v28 = vpop.permute.xlu1 %722  ;;  %v737_v29 = vpop.permute.xlu0 %736 }
 0x222   : > { %v746_v30 = vpack.c.bf16 %v737_v29, %v737_v29  ;;  %v732_v37 = vpack.c.bf16 %v723_v28, %v723_v28 }
 0x224   : > { %v814_v31 = vsel %vm763_vm2, %v746_v30, 0 }
 0x225   : > { %v740_v32 = vpop.permute.xlu0 %739  ;;  %1529 = vmatpush3.bf16.xpose.msra.mxu0 %v814_v31  ;;  %v743_v33 = vpop.permute.xlu1 %742 }
 0x226   : > { %v747_v34 = vpack.c.bf16 %v740_v32, %v740_v32  ;;  %1540 = vmatprep.subr.bf16.mxu0 %v1961_v0  ;;  %v748_v36 = vpack.c.bf16 %v743_v33, %v743_v33 }
 0x228   : > { %v860_v35 = vsel %vm763_vm2, %v747_v34, 0  ;;  %v906_v39 = vsel %vm763_vm2, %v748_v36, 0 }
 0x229   : > { %1535 = vmatpush3.bf16.xpose.msra.mxu1 %v860_v35  ;;  %v726_v38 = vpop.permute.xlu0 %725  ;;  %v729_v41 = vpop.permute.xlu1 %728 }
 0x22a   : > { %1546 = vmatprep.subr.bf16.mxu1 %v1961_v0  ;;  %v733_v40 = vpack.c.bf16 %v726_v38, %v726_v38  ;;  %v734_v42 = vpack.c.bf16 %v729_v41, %v729_v41 }
 0x22c   : > { %1531 = vmatmul.mubr.msk.bf16.vlgmr.msra.gmra.mrb[8].mxu0 %vm763_vm2, %v732_v37 }
 0x22d   : > { %1541 = vmatpush3.bf16.xpose.msra.mxu0 %v906_v39  ;;  %1542 = vmatprep.mubr.msk.bf16.mxu0 %vm1962_vm0, %v1961_v0 }
 0x22e   : > { %1552 = vmatprep.subr.bf16.mxu0 %v1961_v0 }
 0x230   : > { %1537 = vmatmul.mubr.msk.bf16.vlgmr.msra.gmra.mrb[8].mxu1 %vm763_vm2, %v733_v40 }
 0x231   : > { %1548 = vmatprep.mubr.msk.bf16.mxu1 %vm1962_vm0, %v1961_v0  ;;  %1547 = vmatpush3.bf16.msra.mxu1 %v1001_v50 }
 0x232   : > { %1558 = vmatprep.subr.bf16.mxu1 %v1961_v0 }
 0x234   : > { %1543 = vmatmul.mubr.msk.bf16.vlgmr.msra.gmra.mrb[12].mxu0 %vm763_vm2, %v734_v42 }
 0x235   : > { %1554 = vmatprep.mubr.msk.bf16.mxu0 %vm1962_vm0, %v1961_v0 }
 0x28c   : > { %v804_v51 = vpop.f32.mrb[4].mxu1 }
 0x28d   : > { %v1526_v52 = vpop.f32.mrb[5].mxu1  ;;  %v948_v53 = vsel %vm763_vm2, %v804_v51, -inf }
 0x28e   : > { %949 = vmax.xlane.f32.xlu0 %v948_v53  ;;  %v807_v54 = vpop.f32.mrb[6].mxu1 }
 0x28f   : > { %v1527_v55 = vpop.f32.mrb[7].mxu1 }
 0x2ff   : > { %v850_v56 = vpop.f32.mrb[8].mxu0 }
 0x300   : > { %v1532_v57 = vpop.f32.mrb[9].mxu0  ;;  %v951_v58 = vsel %vm763_vm2, %v850_v56, -inf }
 0x301   : > { %952 = vmax.xlane.f32.xlu1 %v951_v58  ;;  %v853_v59 = vpop.f32.mrb[10].mxu0  ;;  %v1681_v57 = vld [vmem:[%s2545_s9] sm:$0xff]   ;;  %v1682_v58 = vld [vmem:[%s2545_s9 + $0x8] sm:$0xff]  }
 0x302   : > { %v1533_v60 = vpop.f32.mrb[11].mxu0 }
 0x303   : > { %v896_v61 = vpop.f32.mrb[8].mxu1 }
 0x304   : > { %v1538_v62 = vpop.f32.mrb[9].mxu1  ;;  %v954_v63 = vsel %vm763_vm2, %v896_v61, -inf }
 0x305   : > { %955 = vmax.xlane.f32.xlu0 %v954_v63  ;;  %v899_v1 = vpop.f32.mrb[10].mxu1 }
 0x306   : > { %v1539_v2 = vpop.f32.mrb[11].mxu1 }
 0x307   : > { %v942_v3 = vpop.f32.mrb[12].mxu0 }
 0x308   : > { %v1544_v4 = vpop.f32.mrb[13].mxu0  ;;  %v957_v5 = vsel %vm763_vm2, %v942_v3, -inf }
 0x309   : > { %958 = vmax.xlane.f32.xlu0 %v957_v5  ;;  %v945_v6 = vpop.f32.mrb[14].mxu0 }
 0x30a   : > { %v1545_v7 = vpop.f32.mrb[15].mxu0 }
 0x312   : > { %750 = vrot.lane.b32.xlu1 %v2374_v45, %s1963_s26  ;;  %s2548_s26 = sld [smem:[#allocation30_spill]] }
 0x31b   : > { %v950_v8 = vpop.xlane.xlu0 %949 }
 0x31c   : > { %v960_v9 = vsub.f32 %v804_v51, %v950_v8 }
 0x31e   : > { %v964_v10 = vmul.f32 1.442695, %v960_v9 }
 0x320   : > { %1683 = vpow2.f32 %v964_v10 }
 0x32a   : > { %v1684_v11 = vpop.eup %1683 }
 0x32b   : > { %v972_v12 = vsel %vm763_vm2, %v1684_v11, 0.0 }
 0x336   : > { %973 = vadd.xlane.f32.xlu1 %v972_v12 }
 0x38e   : > { %v953_v13 = vpop.xlane.xlu1 %952 }
 0x38f   : > { %v961_v14 = vsub.f32 %v850_v56, %v953_v13 }
 0x391   : > { %v966_v15 = vmul.f32 1.442695, %v961_v14  ;;  %v1462_v14 = vld [vmem:[%s2546_s24] ss:$0 sm:$0xff] }
 0x392   : > { %v956_v16 = vpop.xlane.xlu0 %955  ;;  %v751_v17 = vpop.permute.xlu1 %750 }
 0x393   : > { %1685 = vpow2.f32 %v966_v15  ;;  %v962_v18 = vsub.f32 %v896_v61, %v956_v16  ;;  %v760_v19 = vpack.c.bf16 %v751_v17, %v751_v17 }
 0x395   : > { %v968_v20 = vmul.f32 1.442695, %v962_v18  ;;  %v1047_v21 = vsel %vm999_vm3, %v760_v19, 0 }
 0x396   : > { %1553 = vmatpush3.bf16.msra.mxu0 %v1047_v21  ;;  %v959_v22 = vpop.xlane.xlu0 %958 }
 0x397   : > { %1687 = vpow2.f32 %v968_v20  ;;  %v963_v23 = vsub.f32 %v942_v3, %v959_v22  ;;  %1564 = vmatprep.subr.bf16.mxu0 %v1961_v0 }
 0x399   : > { %v970_v24 = vmul.f32 1.442695, %v963_v23 }
 0x39b   : > { %1689 = vpow2.f32 %v970_v24 }
 0x39d   : > { %v1686_v25 = vpop.eup %1685 }
 0x39e   : > { %v975_v26 = vsel %vm763_vm2, %v1686_v25, 0.0 }
 0x39f   : > { %976 = vadd.xlane.f32.xlu0 %v975_v26 }
 0x3a1   : > { %v1688_v27 = vpop.eup %1687 }
 0x3a2   : > { %v978_v28 = vsel %vm763_vm2, %v1688_v27, 0.0 }
 0x3a3   : > { %979 = vadd.xlane.f32.xlu1 %v978_v28 }
 0x3a5   : > { %v1690_v29 = vpop.eup %1689 }
 0x3a6   : > { %v981_v30 = vsel %vm763_vm2, %v1690_v29, 0.0 }
 0x3a7   : > { %982 = vadd.xlane.f32.xlu0 %v981_v30 }
 0x3b4   : > { %756 = vrot.lane.b32.xlu1 %v2374_v45, %s1964_s11  ;;  %s2426_s11 = scalar_lea.hbm %s2548_s26, %s1467_s17 }
 0x3bd   : > { %753 = vrot.lane.b32.xlu0 %v2374_v45, %s1965_s3  ;;  %s1969_s3 = smov [#allocation13]  }
 0x3be   : > { %s1877_s28 = sshll.u32 %s1969_s3, 4  ;;  %s1878_s28 = int_to_ptr.vmem [resolvable:$false] %s1877_s28 }
 0x3bf   : > { %s1879_s1 = scalar_lea.vmem %s1878_s28, 256  ;;  %p1880_p13 = scmp.lt.s32.totalorder %s2428_s20, %s1878_s28 }
 0x3c0   : > { %p1881_p7 = scmp.lt.s32.totalorder %s1879_s1, %s1873_s29 }
 0x3c2   : > { %p1882_p3 = por %p1881_p7, %p1880_p13 }
 0x3c3   : > { %v974_v31 = vpop.xlane.xlu1 %973 }
 0x3c4   : > { %1691 = vrcp.f32 %v974_v31  ;;  %p1883_p5 = pnand %p1882_p3, %p1876_p9 }
 0x3ce   : > { %v1692_v32 = vpop.eup %1691 }
 0x3cf   : > { %v988_v33 = vmul.f32 %v1692_v32, %v1684_v11 }
 0x3d1   : > { %v992_v34 = vpack.c.bf16 %v988_v33, %v988_v33 }
 0x3d3   : > { %1549 = vmatmul.mubr.msk.bf16.vlgmr.msra.gmra.mrb[12].mxu1 %vm763_vm2, %v992_v34 }
 0x3d4   : > { %1560 = vmatprep.mubr.msk.bf16.mxu1 %vm1962_vm0, %v1961_v0 }
 0x42c   : > { %v977_v35 = vpop.xlane.xlu0 %976 }
 0x42d   : > { %1693 = vrcp.f32 %v977_v35 }
 0x430   : > { %v980_v36 = vpop.xlane.xlu1 %979 }
 0x431   : > { %1695 = vrcp.f32 %v980_v36 }
 0x434   : > { %v983_v37 = vpop.xlane.xlu0 %982  ;;  %v757_v38 = vpop.permute.xlu1 %756 }
 0x435   : > { %1697 = vrcp.f32 %v983_v37  ;;  %v762_v41 = vpack.c.bf16 %v757_v38, %v757_v38 }
 0x437   : > { %v1694_v39 = vpop.eup %1693  ;;  %v1139_v48 = vsel %vm999_vm3, %v762_v41, 0 }
 0x438   : > { %v989_v40 = vmul.f32 %v1694_v39, %v1686_v25  ;;  %v754_v42 = vpop.permute.xlu0 %753 }
 0x439   : > { %v761_v43 = vpack.c.bf16 %v754_v42, %v754_v42 }
 0x43a   : > { %v993_v44 = vpack.c.bf16 %v989_v40, %v989_v40 }
 0x43b   : > { %v1696_v45 = vpop.eup %1695  ;;  %v1093_v46 = vsel %vm999_vm3, %v761_v43, 0 }
 0x43c   : > { %v990_v47 = vmul.f32 %v1696_v45, %v1688_v27  ;;  %1555 = vmatmul.mubr.msk.bf16.vlgmr.msra.gmra.mrb[16].mxu0 %vm763_vm2, %v993_v44  ;;  %1559 = vmatpush3.bf16.msra.mxu1 %v1093_v46 }
 0x43d   : > { %1565 = vmatpush3.bf16.msra.mxu0 %v1139_v48  ;;  %1566 = vmatprep.mubr.msk.bf16.mxu0 %vm1962_vm0, %v1961_v0 }
 0x43e   : > { %v994_v49 = vpack.c.bf16 %v990_v47, %v990_v47  ;;  %1570 = vmatprep.subr.bf16.mxu1 %v1961_v0 }
 0x43f   : > { %v1698_v50 = vpop.eup %1697 }
 0x440   : > { %v991_v51 = vmul.f32 %v1698_v50, %v1690_v29  ;;  %1561 = vmatmul.mubr.msk.bf16.vlgmr.msra.gmra.mrb[16].mxu1 %vm763_vm2, %v994_v49 }
 0x441   : > { %1574 = vmatprep.mubr.msk.bf16.mxu1 %vm1962_vm0, %v1961_v0  ;;  %1571 = vmatpush3.bf16.msra.mxu1 %v1681_v57 }
 0x442   : > { %v995_v52 = vpack.c.bf16 %v991_v51, %v991_v51  ;;  %1572 = vmatprep.subr.bf16.mxu1 %v1961_v0 }
 0x444   : > { %1567 = vmatmul.mubr.msk.bf16.vlgmr.msra.gmra.mrb[20].mxu0 %vm763_vm2, %v995_v52 }
 0x445   : > { %1573 = vmatpush3.bf16.msra.mxu1 %v1682_v58 }
 0x4a6   : > { %v1037_v53 = vpop.f32.mrb[12].mxu1 }
 0x4a7   : > { %v1550_v54 = vpop.f32.mrb[13].mxu1 }
 0x4a8   : > { %v1040_v55 = vpop.f32.mrb[14].mxu1 }
 0x4a9   : > { %v1551_v56 = vpop.f32.mrb[15].mxu1 }
 0x50f   : > { %v1083_v59 = vpop.f32.mrb[16].mxu0 }
 0x510   : > { %1182 = vrot.lane.b32.xlu1 %v1083_v59, %s1966_s13  ;;  %v1556_v60 = vpop.f32.mrb[17].mxu0 }
 0x511   : > { %v1086_v61 = vpop.f32.mrb[18].mxu0 }
 0x512   : > { %v1557_v62 = vpop.f32.mrb[19].mxu0 }
 0x513   : > { %v1129_v63 = vpop.f32.mrb[16].mxu1 }
 0x514   : > { %1186 = vrot.lane.b32.xlu0 %v1129_v63, %s1967_s27  ;;  %v1562_v1 = vpop.f32.mrb[17].mxu1 }
 0x515   : > { %v1132_v2 = vpop.f32.mrb[18].mxu1 }
 0x516   : > { %v1563_v3 = vpop.f32.mrb[19].mxu1 }
 0x517   : > { %v1175_v4 = vpop.f32.mrb[20].mxu0 }
 0x518   : > { %1190 = vrot.lane.b32.xlu1 %v1175_v4, %s1968_s30  ;;  %v1568_v0 = vpop.f32.mrb[21].mxu0 }
 0x519   : > { %v1178_v5 = vpop.f32.mrb[22].mxu0 }
 0x51a   : > { %v1569_v6 = vpop.f32.mrb[23].mxu0 }
 0x582   : > { %v1183_v7 = vpop.permute.xlu1 %1182 }
 0x583   : > { %v1193_v9 = vsel %vm763_vm2, %v1037_v53, %v1183_v7 }
 0x586   : > { %v1187_v8 = vpop.permute.xlu0 %1186 }
 0x587   : > { %v1195_v10 = vsel %vm1194_vm4, %v1193_v9, %v1187_v8 }
 0x58a   : > { %v1191_v11 = vpop.permute.xlu1 %1190 }
 0x58b   : > { %v1197_v12 = vsel %vm1196_vm5, %v1195_v10, %v1191_v11 }
 0x58c   : > { %v1198_v13 = vpack.c.bf16 %v1197_v12, %v1197_v12 }
 0x58e   : > { %1575 = vmatmul.mubr.msk.bf16.vlgmr.msra.gmra.mrb[20].mxu1 %vm543_vm1, %v1198_v13 }
 0x661   : > { %v1259_v15 = vpop.f32.mrb[20].mxu1 }
 0x662   : > { %v1260_v16 = vadd.f32 %v1462_v14, %v1259_v15  ;;  %v1576_v17 = vpop.f32.mrb[21].mxu1 }
 0x663   : > { %v1262_v18 = vpop.f32.mrb[22].mxu1 }
 0x664   : > { %v1577_v19 = vpop.f32.mrb[23].mxu1  ;;  %1265 = vst.msk [vmem:[%s514_s6] sm:$0xff] %vm543_vm1, %v1260_v16 }
 0x665   : > { %1886 = shalt.err (!%p1883_p5)
}
 0x666   : > { %s1887_s16 = scalar_lea.hbm %s2426_s11, 128  ;;  %s1891_s13 = scalar_lea.hbm %s2548_s26, 256 }
 0x667   : > { %p1888_p2 = scmp.ne.s32.totalorder %s2426_s11, %s1887_s16  ;;  %p1892_p12 = scmp.lt.u32.totalorder %s2426_s11, %s2548_s26 }
 0x668   : > { %p1893_p1 = scmp.lt.u32.totalorder %s1891_s13, %s1887_s16  ;;  %p1895_p10 = scmp.lt.u32.totalorder %s1887_s16, %s2426_s11 }
 0x669   : > { %p1889_p8 = pnand %p1888_p2, %p2549_p0 }
 0x66a   : > { %p1894_p6 = por %p1893_p1, %p1892_p12 }
 0x66b   : > { %p1890_p11 = pneg %p1889_p8 }
 0x66c   : > { %p1896_p4 = por %p1895_p10, %p1894_p6 }
 0x66e   : > { %p1897_p9 = pnand %p1896_p4, %p1890_p11 }
 0x670   : > { %1900 = shalt.err (!%p1897_p9)
}
 0x671   : > { %1596 = dma.vmem_to_hbm [thread:$0]  (%p2549_p0), %s2428_s20, 128, %s2426_s11, %s1267_s21  }
 0x672 PF: > { %s2550_s23 = sld [smem:[#allocation19_spill]]  ;;  %s2551_s12 = sld [smem:[#allocation21_spill]] }
 0x673   : > { %s2552_s24 = sld [smem:[#allocation20_spill]] }
 0x678   : > { %s1292_s17 = sand.u32 1, %s2550_s23   ;;  %p2553_p13 = scmp.ne.s32.totalorder %s2551_s12, 0 }
 0x679   : > { %p2554_p7 = scmp.ge.s32.totalorder %s2552_s24, 2  ;;  %s1293_s6 = scalar_lea.sflag [#allocation4], %s1292_s17 }
 0x67b   : > { %p1619_p3 = pnand %p2554_p7, %p2553_p13 }
 0x67d   : > { %1934 = dma.done.wait (!%p1619_p3), %s1293_s6, 128  }
 0x67e   : > { %1936 = vsyncadd (!%p1619_p3), %s1293_s6, 4294967168  ;;  %s2555_s20 = sld [smem:[#allocation22_spill]]  ;;  %s2556_s10 = sld [smem:[#allocation23_spill]] }
 0x67f   : > { %s2557_s17 = smov %s1943_s18  ;;  %s2558_s18 = smov %s1947_s19 }
 0x684   : > { %p29_p5 = scmp.ge.s32.totalorder %s2555_s20, 4   ;;  %s2559_s19 = smov %s2556_s10 }
 0x686   :  { %31 = sbr.rel (!%p29_p5) target bundleno = 16 (0x10), region = 145 }
 0x68d   :  { %1298 = vsyncpa [#allocation3], 1 }
 0x68e   :  { %1300 = vsyncpa [#allocation3 + $0x1], 1 }
 0x68f   :  { %1301 = vsyncpa [#allocation6], 1 }
 0x690   :  { %1303 = vsyncpa [#allocation6 + $0x1], 1 }
 0x691   :  { %1304 = vsyncpa [#allocation9], 1 }
 0x692   :  { %1305 = vsyncpa [#allocation12], 1 }
 0x693   :  { %1306 = vsyncpa [#allocation4], 1 }
 0x694   :  { %1308 = vsyncpa [#allocation4 + $0x1], 1 }

// kernel: tpu_custom_call.1
= control target key start
LH: loop header
LB: loop body
LE: loop exit
PB: predicated region body
PF: predicated region fallthrough
CT: control target
= control target key end

     0   :  { %s2471_s0 = inlined_call_operand.hbm [shape: f32[2,8,32], index: 0, kind: input, shape index: {}]   ;;  %s2472_s1 = inlined_call_operand.hbm [shape: f32[2,8,32], index: 1, kind: input, shape index: {}]   ;;  %s2473_s2 = inlined_call_operand.hbm [shape: f32[2,8,32], index: 2, kind: input, shape index: {}]   ;;  %s2474_s3 = inlined_call_operand.hbm [shape: bf16[32,32], index: 3, kind: input, shape index: {}]   ;;  %s2475_s4 = inlined_call_operand.vmem [shape: f32[1,32], index: 4, kind: input, shape index: {}]   ;;  %s2476_s5 = inlined_call_operand.vmem [shape: bf16[32,32], index: 5, kind: input, shape index: {}]   ;;  %s2477_s6 = inlined_call_operand.vmem [shape: f32[1,32], index: 6, kind: input, shape index: {}]   ;;  %s2478_s7 = inlined_call_operand.hbm [shape: bf16[32,32], index: 7, kind: input, shape index: {}]   ;;  %s2479_s8 = inlined_call_operand.hbm [shape: f32[1,32], index: 8, kind: input, shape index: {}]   ;;  %s2480_s9 = inlined_call_operand.vmem [shape: bf16[32,32], index: 9, kind: input, shape index: {}]   ;;  %s2481_s10 = inlined_call_operand.vmem [shape: f32[1,32], index: 10, kind: input, shape index: {}]   ;;  %s2482_s11 = inlined_call_operand.hbm [shape: f32[2,8,32], index: 11, kind: output, shape index: {}]  }
   0x1   :  { %2507 = sst [smem:[#allocation25_spill]] %s2472_s1 }
   0x2   :  { %2508 = sst [smem:[#allocation26_spill]] %s2474_s3 }
   0x3   :  { %2509 = sst [smem:[#allocation27_spill]] %s2477_s6 }
   0x4   :  { %2510 = sst [smem:[#allocation28_spill]] %s2480_s9 }
   0x5   :  { %2511 = sst [smem:[#allocation29_spill]] %s2481_s10 }
   0x6   :  { %2512 = sst [smem:[#allocation30_spill]] %s2482_s11 }
   0x7   :  { %16 = vsyncpa [#allocation3], 0 }
   0x8   :  { %18 = vsyncpa [#allocation3 + $0x1], 0 }
   0x9   :  { %19 = vsyncpa [#allocation6], 0 }
   0xa   :  { %21 = vsyncpa [#allocation6 + $0x1], 0 }
   0xb   :  { %22 = vsyncpa [#allocation9], 0 }
   0xc   :  { %23 = vsyncpa [#allocation12], 0 }
   0xd   :  { %24 = vsyncpa [#allocation4], 0 }
   0xe   :  { %26 = vsyncpa [#allocation4 + $0x1], 0  ;;  %s2030_s17 = smov 0   ;;  %s2032_s18 = smov 0  }
   0xf   :  { %s2034_s19 = smov 0   ;;  %s2036_s20 = smov 0  }
  0x10 LB: > { %2513 = sst [smem:[#allocation19_spill]] %s1939_s17  ;;  %s2051_s21 = sadd.s32 4294967295, %s1951_s20   ;;  %s1951_s20 = sphi %s2036_s20, %s2555_s20   ;;  %s1947_s19 = sphi %s2034_s19, %s2559_s19   ;;  %s1943_s18 = sphi %s2032_s18, %s2558_s18   ;;  %s1939_s17 = sphi %s2030_s17, %s2557_s17  }
  0x11   : > { %2514 = sst [smem:[#allocation20_spill]] %s1951_s20  ;;  %s1422_s22 = sadd.s32 4294967294, %s1951_s20  }
  0x12   : > { %p52_p0 = scmp.ne.s32.totalorder %s1943_s18, %s1939_s17  ;;  %p2485_p1 = scmp.eq.s32.totalorder %s2051_s21, 0 }
  0x13   : > { %p302_p3 = scmp.eq.s32.totalorder %s1422_s22, 1  ;;  %p1423_p5 = scmp.ge.s32.totalorder %s1951_s20, 1 }
  0x14   : > { %p2060_p4 = por %p2485_p1, %p52_p0  ;;  %p309_p7 = scmp.lt.s32.totalorder %s1951_s20, 3 }
  0x15   : > { %p2065_p6 = por %p302_p3, %p52_p0  ;;  %s1953_s26 = smov [#allocation8]  }
  0x16   : > { %s2515_s23 = scalar_select %p2060_p4, 1, 0 }
  0x17   : > { %s2516_s24 = scalar_select %p2065_p6, 1, 0 }
  0x18   : > { %p2070_p8 = pnand %p1423_p5, %p309_p7  ;;  %s321_s27 = sshll.u32 %s1953_s26, 4  ;;  %s2074_s27 = int_to_ptr.vmem [resolvable:$true] %s321_s27 }
  0x19   : > { %2517 = sst [smem:[#allocation21_spill]] %s2516_s24  ;;  %s2086_s29 = sadd.s32 1, %s1951_s20  }
  0x1a   : > { %s2518_s25 = scalar_select %p2070_p8, 1, 0 }
  0x1b   : > { %p1598_p9 = pneg %p2070_p8  ;;  %2520 = sst [smem:[#allocation22_spill]] %s2086_s29 }
  0x1c   : > { %s39_s30 = sadd.s32 1, %s1947_s19  ;;  %s36_s12 = ssub.s32 %s1951_s20, %s2086_s29 }
  0x1d   : > { %p2081_p11 = pnand %p1598_p9, %p2485_p1  ;;  %s2521_s3 = sld [smem:[#allocation26_spill]] }
  0x1f   : > { %s2519_s28 = scalar_select %p2081_p11, 1, 0 }
  0x20   : > { %p2099_p13 = pneg %p2081_p11 }
  0x22   : > { %s2522_s26 = scalar_select %p2099_p13, 1, 0 }
  0x23   : > { %s1699_s15 = scalar_lea.hbm %s2521_s3, 256 }
  0x24   : > { %p1700_p12 = scmp.ne.s32.totalorder %s2521_s3, %s1699_s15  ;;  %p1706_p5 = scmp.lt.u32.totalorder %s1699_s15, %s2521_s3 }
  0x26   : > { %p1702_p0 = pnand %p2099_p13, %p1700_p12 }
  0x28   : > { %p1703_p3 = pneg %p1702_p0 }
  0x2a   : > { %p1708_p7 = pnand %p1706_p5, %p1703_p3 }
  0x2c   : > { %1711 = shalt.err (!%p1708_p7)
}
  0x2d   : > { %s1712_s13 = scalar_lea.vmem %s2074_s27, 256  ;;  %p1720_p2 = scmp.lt.s32.totalorder %s2074_s27, %s2074_s27 }
  0x2e   : > { %p1713_p9 = scmp.ne.s32.totalorder %s2074_s27, %s1712_s13  ;;  %p1721_p6 = scmp.lt.s32.totalorder %s1712_s13, %s1712_s13 }
  0x30   : > { %p1715_p10 = pnand %p1713_p9, %p2099_p13  ;;  %p1722_p12 = por %p1721_p6, %p1720_p2 }
  0x32   : > { %p1716_p1 = pneg %p1715_p10 }
  0x34   : > { %p1723_p0 = pnand %p1722_p12, %p1716_p1 }
  0x36   : > { %1726 = shalt.err (!%p1723_p0)
}
  0x37   : > { %s2489_s14 = smov 64   ;;  %s2490_s17 = smov 4  }
  0x38   : > { %1601 = dma.hbm_to_vmem [thread:$0]  (!%p2081_p11), %s2521_s3, 256, %s2074_s27, [#allocation9], %s2489_s14, %s2489_s14, %s2490_s17  }
  0x39   : > { %p37_p1 = scmp.eq.s32.totalorder %s36_s12, 0  ;;  %p46_p2 = scmp.ne.s32.totalorder %s1947_s19, %s1943_s18 }
  0x3a   : > { %p47_p6 = scmp.eq.s32.totalorder %s1951_s20, 0  ;;  %p1625_p10 = scmp.lt.s32.totalorder %s1951_s20, 2 }
  0x3b   : > { %s2128_s16 = scalar_select %p37_p1, %s1947_s19, %s39_s30  }
  0x3c   : > { %p48_p3 = por %p47_p6, %p46_p2  ;;  %p2524_p5 = scmp.eq.s32.totalorder %s2051_s21, 1 }
  0x3d   : > { %2523 = sst [smem:[#allocation23_spill]] %s2128_s16  ;;  %s2491_s13 = sand.u32 1, %s1947_s19  }
  0x3e   : > { %p2132_p7 = por %p2524_p5, %p46_p2  ;;  %s2138_s29 = sshll.u32 %s1951_s20, 7 }
  0x3f   : > { %s2142_s11 = sshll.u32 %s2491_s13, 3  ;;  %p2144_p9 = pnand %p1625_p10, %p48_p3 }
  0x40   : > { %s2525_s22 = scalar_select %p2132_p7, 1, 0 }
  0x41   : > { %s2527_s27 = scalar_select %p2144_p9, 1, 0 }
  0x42   : > { %2526 = sst [smem:[#allocation24_spill]] %s2525_s22  ;;  %s392_s30 = sand.u32 1, %s1951_s20  }
  0x43   : > { %s2528_s1 = sld [smem:[#allocation25_spill]]  ;;  %s396_s14 = scalar_lea.vmem [#allocation5], %s2142_s11 }
  0x44   : > { %s403_s17 = sshll.u32 %s396_s14, 4  ;;  %s2158_s13 = scalar_lea.sflag [#allocation6], %s392_s30  ;;  %s2156_s17 = int_to_ptr.vmem [resolvable:$true] %s403_s17 }
  0x45   : > { %p2164_p0 = pneg %p2144_p9 }
  0x47   : > { %s2529_s16 = scalar_select %p2164_p0, 1, 0 }
  0x49   : > { %s2153_s15 = scalar_lea.hbm %s2528_s1, %s2138_s29  ;;  %s1732_s20 = scalar_lea.hbm %s2528_s1, 256 }
  0x4a   : > { %s1727_s3 = scalar_lea.hbm %s2153_s15, 128  ;;  %p1733_p6 = scmp.lt.u32.totalorder %s2153_s15, %s2528_s1 }
  0x4b   : > { %p1728_p12 = scmp.ne.s32.totalorder %s2153_s15, %s1727_s3  ;;  %p1734_p10 = scmp.lt.u32.totalorder %s1732_s20, %s1727_s3 }
  0x4c   : > { %p1736_p5 = scmp.lt.u32.totalorder %s1727_s3, %s2153_s15 }
  0x4d   : > { %p1730_p1 = pnand %p2164_p0, %p1728_p12  ;;  %p1735_p3 = por %p1734_p10, %p1733_p6 }
  0x4f   : > { %p1731_p2 = pneg %p1730_p1  ;;  %p1737_p7 = por %p1736_p5, %p1735_p3 }
  0x51   : > { %p1738_p4 = pnand %p1737_p7, %p1731_p2 }
  0x53   : > { %1741 = shalt.err (!%p1738_p4)
}
  0x54   : > { %s1742_s30 = scalar_lea.vmem %s2156_s17, 128  ;;  %s1956_s12 = smov [#allocation5]  }
  0x55   : > { %p1743_p12 = scmp.ne.s32.totalorder %s2156_s17, %s1742_s30  ;;  %s1747_s24 = sshll.u32 %s1956_s12, 4  ;;  %s1748_s24 = int_to_ptr.vmem [resolvable:$false] %s1747_s24 }
  0x56   : > { %s1749_s22 = scalar_lea.vmem %s1748_s24, 256  ;;  %p1750_p11 = scmp.lt.s32.totalorder %s2156_s17, %s1748_s24 }
  0x57   : > { %p1745_p1 = pnand %p1743_p12, %p2164_p0  ;;  %p1751_p13 = scmp.lt.s32.totalorder %s1749_s22, %s1742_s30 }
  0x59   : > { %p1746_p8 = pneg %p1745_p1  ;;  %p1752_p6 = por %p1751_p13, %p1750_p11 }
  0x5b   : > { %p1753_p10 = pnand %p1752_p6, %p1746_p8 }
  0x5d   : > { %1756 = shalt.err (!%p1753_p10)
}
  0x5e   : > { %1614 = dma.hbm_to_vmem [thread:$0]  (!%p2144_p9), %s2153_s15, 128, %s2156_s17, %s2158_s13  }
  0x5f   : > { %s1957_s3 = smov [#allocation10]   ;;  %s1958_s14 = smov [#allocation11]  }
  0x60   : > { %s343_s20 = sshll.u32 %s1957_s3, 4  ;;  %s357_s1 = sshll.u32 %s1958_s14, 4  ;;  %s344_s20 = int_to_ptr.vmem [resolvable:$true] %s343_s20  ;;  %s358_s1 = int_to_ptr.vmem [resolvable:$true] %s357_s1 }
  0x61   : > { %s1757_s24 = scalar_lea.hbm %s2478_s7, 256  ;;  %p2530_p8 = scmp.ne.s32.totalorder %s2522_s26, 0 }
  0x62   : > { %p1758_p4 = scmp.ne.s32.totalorder %s2478_s7, %s1757_s24  ;;  %p1764_p7 = scmp.lt.u32.totalorder %s1757_s24, %s2478_s7 }
  0x64   : > { %p1760_p11 = pnand %p1758_p4, %p2530_p8 }
  0x66   : > { %p1761_p13 = pneg %p1760_p11 }
  0x68   : > { %p1766_p2 = pnand %p1764_p7, %p1761_p13 }
  0x6a   : > { %1769 = shalt.err (!%p1766_p2)
}
  0x6b   : > { %s1770_s17 = scalar_lea.vmem %s344_s20, 256  ;;  %p1778_p1 = scmp.lt.s32.totalorder %s344_s20, %s344_s20 }
  0x6c   : > { %p1771_p3 = scmp.ne.s32.totalorder %s344_s20, %s1770_s17  ;;  %p1779_p6 = scmp.lt.s32.totalorder %s1770_s17, %s1770_s17 }
  0x6e   : > { %p1773_p5 = pnand %p1771_p3, %p2530_p8  ;;  %p1780_p10 = por %p1779_p6, %p1778_p1 }
  0x70   : > { %p1774_p12 = pneg %p1773_p5 }
  0x72   : > { %p1781_p9 = pnand %p1780_p10, %p1774_p12 }
  0x74   : > { %1784 = shalt.err (!%p1781_p9)
}
  0x75   : > { %p2531_p4 = scmp.ne.s32.totalorder %s2519_s28, 0  ;;  %s2532_s10 = smov 4  }
  0x76   : > { %s2533_s15 = smov 64   ;;  %s1785_s12 = scalar_lea.hbm %s2479_s8, 16 }
  0x77   : > { %1604 = dma.hbm_to_vmem [thread:$0]  (!%p2531_p4), %s2478_s7, 256, %s344_s20, [#allocation9], %s2533_s15, %s2533_s15, %s2532_s10  }
  0x78   : > { %p1786_p11 = scmp.ne.s32.totalorder %s2479_s8, %s1785_s12  ;;  %p1792_p7 = scmp.lt.u32.totalorder %s1785_s12, %s2479_s8 }
  0x7a   : > { %p1788_p9 = pnand %p1786_p11, %p2530_p8 }
  0x7c   : > { %p1789_p13 = pneg %p1788_p9 }
  0x7e   : > { %p1794_p2 = pnand %p1792_p7, %p1789_p13 }
  0x80   : > { %1797 = shalt.err (!%p1794_p2)
}
  0x81   : > { %s1798_s6 = scalar_lea.vmem %s358_s1, 16  ;;  %s1805_s20 = scalar_lea.vmem %s358_s1, 32 }
  0x82   : > { %p1799_p3 = scmp.ne.s32.totalorder %s358_s1, %s1798_s6  ;;  %p1806_p1 = scmp.lt.s32.totalorder %s358_s1, %s358_s1 }
  0x83   : > { %p1807_p6 = scmp.lt.s32.totalorder %s1805_s20, %s1798_s6 }
  0x84   : > { %p1801_p5 = pnand %p1799_p3, %p2530_p8 }
  0x85   : > { %p1808_p10 = por %p1807_p6, %p1806_p1 }
  0x86   : > { %p1802_p12 = pneg %p1801_p5 }
  0x88   : > { %p1809_p0 = pnand %p1808_p10, %p1802_p12 }
  0x8a   : > { %1812 = shalt.err (!%p1809_p0)
}
  0x8b   : > { %1607 = dma.hbm_to_vmem [thread:$0]  (!%p2531_p4), %s2479_s8, 16, %s358_s1, [#allocation12]  }
  0x8c   : > { %s2231_s3 = scalar_lea.hbm %s2471_s0, %s2138_s29  ;;  %s378_s14 = scalar_lea.vmem [#allocation2], %s2142_s11 }
  0x8d   : > { %s385_s28 = sshll.u32 %s378_s14, 4  ;;  %s2240_s30 = scalar_lea.hbm %s2473_s2, %s2138_s29  ;;  %s2234_s28 = int_to_ptr.vmem [resolvable:$true] %s385_s28 }
  0x8e   : > { %s2534_s22 = sand.u32 1, %s1947_s19   ;;  %s1813_s17 = scalar_lea.hbm %s2231_s3, 128 }
  0x8f   : > { %s375_s1 = scalar_lea.sflag [#allocation3], %s2534_s22  ;;  %p1814_p0 = scmp.ne.s32.totalorder %s2231_s3, %s1813_s17 }
  0x90   : > { %p2535_p8 = scmp.ne.s32.totalorder %s2529_s16, 0  ;;  %s1818_s10 = scalar_lea.hbm %s2471_s0, 256 }
  0x91   : > { %p1819_p9 = scmp.lt.u32.totalorder %s2231_s3, %s2471_s0  ;;  %p1820_p13 = scmp.lt.u32.totalorder %s1818_s10, %s1813_s17 }
  0x92   : > { %p1816_p4 = pnand %p1814_p0, %p2535_p8  ;;  %p1822_p2 = scmp.lt.u32.totalorder %s1813_s17, %s2231_s3 }
  0x93   : > { %p1821_p7 = por %p1820_p13, %p1819_p9 }
  0x94   : > { %p1817_p11 = pneg %p1816_p4 }
  0x95   : > { %p1823_p3 = por %p1822_p2, %p1821_p7 }
  0x97   : > { %p1824_p5 = pnand %p1823_p3, %p1817_p11 }
  0x99   : > { %1827 = shalt.err (!%p1824_p5)
}
  0x9a   : > { %s1828_s29 = scalar_lea.vmem %s2234_s28, 128  ;;  %s1959_s9 = smov [#allocation2]  }
  0x9b   : > { %p1829_p12 = scmp.ne.s32.totalorder %s2234_s28, %s1828_s29  ;;  %s1833_s14 = sshll.u32 %s1959_s9, 4  ;;  %s1834_s14 = int_to_ptr.vmem [resolvable:$false] %s1833_s14 }
  0x9c   : > { %s1835_s12 = scalar_lea.vmem %s1834_s14, 256  ;;  %p1836_p10 = scmp.lt.s32.totalorder %s2234_s28, %s1834_s14 }
  0x9d   : > { %p1831_p1 = pnand %p1829_p12, %p2535_p8  ;;  %p1837_p0 = scmp.lt.s32.totalorder %s1835_s12, %s1828_s29 }
  0x9f   : > { %p1832_p6 = pneg %p1831_p1  ;;  %p1838_p4 = por %p1837_p0, %p1836_p10 }
  0xa1   : > { %p1839_p9 = pnand %p1838_p4, %p1832_p6 }
  0xa3   : > { %1842 = shalt.err (!%p1839_p9)
}
  0xa4   : > { %p2536_p11 = scmp.ne.s32.totalorder %s2527_s27, 0  ;;  %s414_s24 = scalar_lea.vmem [#allocation7], %s2142_s11 }
  0xa5   : > { %s421_s22 = sshll.u32 %s414_s24, 4  ;;  %s1843_s17 = scalar_lea.hbm %s2240_s30, 128  ;;  %s422_s22 = int_to_ptr.vmem [resolvable:$true] %s421_s22 }
  0xa6   : > { %1611 = dma.hbm_to_vmem [thread:$0]  (!%p2536_p11), %s2231_s3, 128, %s2234_s28, %s375_s1  }
  0xa7   : > { %p1844_p13 = scmp.ne.s32.totalorder %s2240_s30, %s1843_s17  ;;  %s1848_s10 = scalar_lea.hbm %s2473_s2, 256 }
  0xa8   : > { %p1849_p3 = scmp.lt.u32.totalorder %s2240_s30, %s2473_s2  ;;  %p1850_p5 = scmp.lt.u32.totalorder %s1848_s10, %s1843_s17 }
  0xa9   : > { %p1846_p7 = pnand %p1844_p13, %p2535_p8  ;;  %p1852_p1 = scmp.lt.u32.totalorder %s1843_s17, %s2240_s30 }
  0xaa   : > { %p1851_p12 = por %p1850_p5, %p1849_p3 }
  0xab   : > { %p1847_p2 = pneg %p1846_p7 }
  0xac   : > { %p1853_p6 = por %p1852_p1, %p1851_p12 }
  0xae   : > { %p1854_p10 = pnand %p1853_p6, %p1847_p2 }
  0xb0   : > { %1857 = shalt.err (!%p1854_p10)
}
  0xb1   : > { %s1858_s11 = scalar_lea.vmem %s422_s22, 128  ;;  %s1960_s3 = smov [#allocation7]  }
  0xb2   : > { %p1859_p0 = scmp.ne.s32.totalorder %s422_s22, %s1858_s11  ;;  %s1863_s28 = sshll.u32 %s1960_s3, 4  ;;  %s1864_s28 = int_to_ptr.vmem [resolvable:$false] %s1863_s28 }
  0xb3   : > { %s1865_s1 = scalar_lea.vmem %s1864_s28, 256  ;;  %p1866_p13 = scmp.lt.s32.totalorder %s422_s22, %s1864_s28 }
  0xb4   : > { %p1861_p4 = pnand %p1859_p0, %p2535_p8  ;;  %p1867_p7 = scmp.lt.s32.totalorder %s1865_s1, %s1858_s11 }
  0xb6   : > { %p1862_p9 = pneg %p1861_p4  ;;  %p1868_p11 = por %p1867_p7, %p1866_p13 }
  0xb8   : > { %p1869_p3 = pnand %p1868_p11, %p1862_p9 }
  0xba   : > { %1872 = shalt.err (!%p1869_p3)
}
  0xbb   : > { %p2537_p5 = scmp.ne.s32.totalorder %s2527_s27, 0  ;;  %p2538_p2 = scmp.ne.s32.totalorder %s2518_s25, 0 }
  0xbc   : > { %s2287_s16 = sand.u32 (!%p2538_p2), 1, %s1943_s18   ;;  %p2539_p8 = scmp.ne.s32.totalorder (!%p2538_p2), %s2515_s23, 0 }
  0xbd   : > { %1617 = dma.hbm_to_vmem [thread:$0]  (!%p2537_p5), %s2240_s30, 128, %s422_s22, %s2158_s13  }
  0xbe   : > { %430 = sbr.rel (%p2538_p2) target bundleno = 1650 (0x672), region = 64  ;;  %s2290_s29 = sshll.u32 (!%p2538_p2), %s2287_s16, 3 }
  0xbf   : > { %s433_s9 = scalar_lea.sflag (!%p2538_p2), [#allocation3], %s2287_s16  ;;  %s436_s14 = scalar_lea.vmem (!%p2538_p2), [#allocation2], %s2290_s29 }
  0xc5   : > { %1918 = dma.done.wait (%p2539_p8), %s433_s9, 128  }
  0xc6   : > { %1920 = vsyncadd (%p2539_p8), %s433_s9, 4294967168  ;;  %s441_s25 = sand.u32 1, %s2051_s21   ;;  %s445_s27 = scalar_lea.vmem [#allocation5], %s2290_s29 }
  0xc7   : > { %s442_s13 = scalar_lea.sflag [#allocation6], %s441_s25 }
  0xc8   : > { %1922 = dma.done.wait (%p2539_p8), %s442_s13, 256  }
  0xc9   : > { %1924 = vsyncadd (%p2539_p8), %s442_s13, 4294967040  ;;  %s454_s30 = scalar_lea.vmem [#allocation7], %s2290_s29  ;;  %p2540_p11 = scmp.eq.s32.totalorder %s2051_s21, 0 }
  0xcb   : > { %1926 = dma.done.wait (%p2540_p11), [#allocation9], 512   ;;  %p2541_p12 = pmov %p2540_p11 }
  0xcc   : > { %p2542_p1 = pmov %p2540_p11 }
  0xcd   : > { %1928 = vsyncadd (%p2541_p12), [#allocation9], 4294966784 }
  0xce   : > { %1930 = dma.done.wait (%p2542_p1), [#allocation12], 16   ;;  %p2543_p6 = pmov %p2542_p1 }
  0xcf   : > { %v1961_v0 = vmov 0.0   ;;  %vm1962_vm0 = vmmov 0   ;;  %v1675_v1 = vld [vmem:[#allocation8] sm:$0xff]   ;;  %v1676_v2 = vld [vmem:[%s2476_s5] sm:$0xff]   ;;  %v1677_v3 = vld [vmem:[#allocation8 + $0x8] sm:$0xff]   ;;  %vm543_vm1 = vcmask 261120  }
  0xd0   : > { %1932 = vsyncadd (%p2543_p6), [#allocation12], 4294967280  ;;  %1498 = vmatprep.subr.bf16.mxu0 %v1961_v0  ;;  %1506 = vmatprep.subr.bf16.mxu1 %v1961_v0  ;;  %v1678_v4 = vld [vmem:[%s2476_s5 + $0x8] sm:$0xff]   ;;  %v517_v6 = vld [vmem:[%s445_s27] sm:$0xff]  ;;  %s2544_s15 = sld [smem:[#allocation27_spill]]  ;;  %s1963_s26 = smov 120  }
  0xd1   : > { %1502 = vmatprep.mubr.msk.bf16.mxu0 %vm1962_vm0, %v1961_v0  ;;  %1510 = vmatprep.mubr.msk.bf16.mxu1 %vm1962_vm0, %v1961_v0  ;;  %v516_v5 = vld [vmem:[%s436_s14] sm:$0xff]  ;;  %v587_v8 = vpack.c.bf16 %v517_v6, %v517_v6  ;;  %vm763_vm2 = vcmask 64512   ;;  %s1964_s11 = smov 104   ;;  %s1965_s3 = smov 112   ;;  %v1450_v43 = vld [vmem:[#allocation11] ss:$0 sm:$0xff] }
  0xd2   : > { %1499 = vmatpush3.bf16.msra.mxu0 %v1675_v1  ;;  %1507 = vmatpush3.bf16.msra.mxu1 %v1676_v2  ;;  %v519_v7 = vpack.c.bf16 %v516_v5, %v516_v5  ;;  %v1679_v9 = vld [vmem:[#allocation10] sm:$0xff]   ;;  %v1680_v10 = vld [vmem:[#allocation10 + $0x8] sm:$0xff]   ;;  %vm999_vm3 = vcmask 1043456   ;;  %s2545_s9 = sld [smem:[#allocation28_spill]]  ;;  %s1966_s13 = smov 8   ;;  %vm1194_vm4 = vcmask 130048  }
  0xd3   : > { %1500 = vmatprep.subr.bf16.mxu0 %v1961_v0  ;;  %1508 = vmatprep.subr.bf16.mxu1 %v1961_v0  ;;  %v518_v11 = vld [vmem:[%s454_s30] sm:$0xff]  ;;  %s1967_s27 = smov 16   ;;  %s1968_s30 = smov 24   ;;  %vm1196_vm5 = vcmask 195584  }
  0xd4   : > { %v654_v12 = vpack.c.bf16 %v518_v11, %v518_v11  ;;  %v1442_v13 = vld [vmem:[%s2475_s4] ss:$0 sm:$0xff]  ;;  %s2546_s24 = sld [smem:[#allocation29_spill]]  ;;  %s2547_s22 = sld [smem:[#allocation24_spill]] }
  0xd5   : > { %s1467_s17 = sshll.u32 %s2051_s21, 7  ;;  %s514_s6 = scalar_lea.vmem [#allocation13], %s2290_s29 }
  0xd6   : > { %1501 = vmatpush3.bf16.msra.mxu0 %v1677_v3  ;;  %1509 = vmatpush3.bf16.msra.mxu1 %v1678_v4  ;;  %v1446_v14 = vld [vmem:[%s2544_s15] ss:$0 sm:$0xff]  ;;  %s1280_s20 = sshll.u32 %s514_s6, 4  ;;  %s1267_s21 = scalar_lea.sflag [#allocation4], %s2287_s16  ;;  %s2428_s20 = int_to_ptr.vmem [resolvable:$true] %s1280_s20 }
  0xd7   : > { %1514 = vmatprep.subr.bf16.mxu0 %v1961_v0  ;;  %1522 = vmatprep.subr.bf16.mxu1 %v1961_v0  ;;  %s1873_s29 = scalar_lea.vmem %s2428_s20, 128 }
  0xd8   : > { %p1874_p10 = scmp.ne.s32.totalorder %s2428_s20, %s1873_s29 }
  0xd9   : > { %1503 = vmatmul.mubr.msk.bf16.vlgmr.msra.gmra.mrb[0].mxu0 %vm543_vm1, %v519_v7  ;;  %1511 = vmatmul.mubr.msk.bf16.vlgmr.msra.gmra.mrb[0].mxu1 %vm543_vm1, %v587_v8 }
  0xda   : > { %1518 = vmatprep.mubr.msk.bf16.mxu0 %vm1962_vm0, %v1961_v0  ;;  %1524 = vmatprep.mubr.msk.bf16.mxu1 %vm1962_vm0, %v1961_v0  ;;  %p2549_p0 = scmp.ne.s32.totalorder %s2547_s22, 0 }
  0xdb   : > { %1515 = vmatpush3.bf16.msra.mxu0 %v1679_v9 }
  0xdc   : > { %1516 = vmatprep.subr.bf16.mxu0 %v1961_v0  ;;  %p1875_p4 = pnand %p1874_p10, %p2549_p0 }
  0xde   : > { %p1876_p9 = pneg %p1875_p4 }
  0xdf   : > { %1517 = vmatpush3.bf16.msra.mxu0 %v1680_v10 }
  0xe0   : > { %1528 = vmatprep.subr.bf16.mxu0 %v1961_v0 }
  0xe2   : > { %1519 = vmatmul.mubr.msk.bf16.vlgmr.msra.gmra.mrb[4].mxu0 %vm543_vm1, %v654_v12 }
  0xe3   : > { %1530 = vmatprep.mubr.msk.bf16.mxu0 %vm1962_vm0, %v1961_v0 }
 0x1ac   : > { %v581_v15 = vpop.f32.mrb[0].mxu0  ;;  %v648_v17 = vpop.f32.mrb[0].mxu1 }
 0x1ad   : > { %v582_v16 = vadd.f32 %v1442_v13, %v581_v15  ;;  %v1504_v18 = vpop.f32.mrb[1].mxu0  ;;  %v649_v19 = vadd.f32 %v1446_v14, %v648_v17  ;;  %v1512_v20 = vpop.f32.mrb[1].mxu1 }
 0x1ae   : > { %v584_v21 = vpop.f32.mrb[2].mxu0  ;;  %v651_v22 = vpop.f32.mrb[2].mxu1 }
 0x1af   : > { %722 = vrot.lane.b32.xlu1 %v582_v16, %s1963_s26  ;;  %v1505_v23 = vpop.f32.mrb[3].mxu0  ;;  %736 = vrot.lane.b32.xlu0 %v649_v19, %s1963_s26  ;;  %v1513_v24 = vpop.f32.mrb[3].mxu1  ;;  %v745_v25 = vpack.c.bf16 %v649_v19, %v649_v19  ;;  %v731_v27 = vpack.c.bf16 %v582_v16, %v582_v16 }
 0x1b1   : > { %v768_v26 = vsel %vm763_vm2, %v745_v25, 0 }
 0x1b2   : > { %1523 = vmatpush3.bf16.xpose.msra.mxu1 %v768_v26 }
 0x1b3   : > { %742 = vrot.lane.b32.xlu1 %v649_v19, %s1964_s11  ;;  %739 = vrot.lane.b32.xlu0 %v649_v19, %s1965_s3 }
 0x1b4   : > { %1534 = vmatprep.subr.bf16.mxu1 %v1961_v0 }
 0x1b5   : > { %v715_v44 = vpop.f32.mrb[4].mxu0 }
 0x1b6   : > { %v2374_v45 = vadd.f32 %v1450_v43, %v715_v44  ;;  %v1520_v46 = vpop.f32.mrb[5].mxu0 }
 0x1b7   : > { %728 = vrot.lane.b32.xlu1 %v582_v16, %s1964_s11  ;;  %725 = vrot.lane.b32.xlu0 %v582_v16, %s1965_s3  ;;  %v718_v47 = vpop.f32.mrb[6].mxu0 }
 0x1b8   : > { %v1521_v48 = vpop.f32.mrb[7].mxu0  ;;  %v759_v49 = vpack.c.bf16 %v2374_v45, %v2374_v45 }
 0x1b9   : > { %1525 = vmatmul.mubr.msk.bf16.vlgmr.msra.gmra.mrb[4].mxu1 %vm763_vm2, %v731_v27 }
 0x1ba   : > { %1536 = vmatprep.mubr.msk.bf16.mxu1 %vm1962_vm0, %v1961_v0  ;;  %v1001_v50 = vsel %vm999_vm3, %v759_v49, 0 }
 0x221   : > { %v723_v28 = vpop.permute.xlu1 %722  ;;  %v737_v29 = vpop.permute.xlu0 %736 }
 0x222   : > { %v746_v30 = vpack.c.bf16 %v737_v29, %v737_v29  ;;  %v732_v37 = vpack.c.bf16 %v723_v28, %v723_v28 }
 0x224   : > { %v814_v31 = vsel %vm763_vm2, %v746_v30, 0 }
 0x225   : > { %v740_v32 = vpop.permute.xlu0 %739  ;;  %1529 = vmatpush3.bf16.xpose.msra.mxu0 %v814_v31  ;;  %v743_v33 = vpop.permute.xlu1 %742 }
 0x226   : > { %v747_v34 = vpack.c.bf16 %v740_v32, %v740_v32  ;;  %1540 = vmatprep.subr.bf16.mxu0 %v1961_v0  ;;  %v748_v36 = vpack.c.bf16 %v743_v33, %v743_v33 }
 0x228   : > { %v860_v35 = vsel %vm763_vm2, %v747_v34, 0  ;;  %v906_v39 = vsel %vm763_vm2, %v748_v36, 0 }
 0x229   : > { %1535 = vmatpush3.bf16.xpose.msra.mxu1 %v860_v35  ;;  %v726_v38 = vpop.permute.xlu0 %725  ;;  %v729_v41 = vpop.permute.xlu1 %728 }
 0x22a   : > { %1546 = vmatprep.subr.bf16.mxu1 %v1961_v0  ;;  %v733_v40 = vpack.c.bf16 %v726_v38, %v726_v38  ;;  %v734_v42 = vpack.c.bf16 %v729_v41, %v729_v41 }
 0x22c   : > { %1531 = vmatmul.mubr.msk.bf16.vlgmr.msra.gmra.mrb[8].mxu0 %vm763_vm2, %v732_v37 }
 0x22d   : > { %1541 = vmatpush3.bf16.xpose.msra.mxu0 %v906_v39  ;;  %1542 = vmatprep.mubr.msk.bf16.mxu0 %vm1962_vm0, %v1961_v0 }
 0x22e   : > { %1552 = vmatprep.subr.bf16.mxu0 %v1961_v0 }
 0x230   : > { %1537 = vmatmul.mubr.msk.bf16.vlgmr.msra.gmra.mrb[8].mxu1 %vm763_vm2, %v733_v40 }
 0x231   : > { %1548 = vmatprep.mubr.msk.bf16.mxu1 %vm1962_vm0, %v1961_v0  ;;  %1547 = vmatpush3.bf16.msra.mxu1 %v1001_v50 }
 0x232   : > { %1558 = vmatprep.subr.bf16.mxu1 %v1961_v0 }
 0x234   : > { %1543 = vmatmul.mubr.msk.bf16.vlgmr.msra.gmra.mrb[12].mxu0 %vm763_vm2, %v734_v42 }
 0x235   : > { %1554 = vmatprep.mubr.msk.bf16.mxu0 %vm1962_vm0, %v1961_v0 }
 0x28c   : > { %v804_v51 = vpop.f32.mrb[4].mxu1 }
 0x28d   : > { %v1526_v52 = vpop.f32.mrb[5].mxu1  ;;  %v948_v53 = vsel %vm763_vm2, %v804_v51, -inf }
 0x28e   : > { %949 = vmax.xlane.f32.xlu0 %v948_v53  ;;  %v807_v54 = vpop.f32.mrb[6].mxu1 }
 0x28f   : > { %v1527_v55 = vpop.f32.mrb[7].mxu1 }
 0x2ff   : > { %v850_v56 = vpop.f32.mrb[8].mxu0 }
 0x300   : > { %v1532_v57 = vpop.f32.mrb[9].mxu0  ;;  %v951_v58 = vsel %vm763_vm2, %v850_v56, -inf }
 0x301   : > { %952 = vmax.xlane.f32.xlu1 %v951_v58  ;;  %v853_v59 = vpop.f32.mrb[10].mxu0  ;;  %v1681_v57 = vld [vmem:[%s2545_s9] sm:$0xff]   ;;  %v1682_v58 = vld [vmem:[%s2545_s9 + $0x8] sm:$0xff]  }
 0x302   : > { %v1533_v60 = vpop.f32.mrb[11].mxu0 }
 0x303   : > { %v896_v61 = vpop.f32.mrb[8].mxu1 }
 0x304   : > { %v1538_v62 = vpop.f32.mrb[9].mxu1  ;;  %v954_v63 = vsel %vm763_vm2, %v896_v61, -inf }
 0x305   : > { %955 = vmax.xlane.f32.xlu0 %v954_v63  ;;  %v899_v1 = vpop.f32.mrb[10].mxu1 }
 0x306   : > { %v1539_v2 = vpop.f32.mrb[11].mxu1 }
 0x307   : > { %v942_v3 = vpop.f32.mrb[12].mxu0 }
 0x308   : > { %v1544_v4 = vpop.f32.mrb[13].mxu0  ;;  %v957_v5 = vsel %vm763_vm2, %v942_v3, -inf }
 0x309   : > { %958 = vmax.xlane.f32.xlu0 %v957_v5  ;;  %v945_v6 = vpop.f32.mrb[14].mxu0 }
 0x30a   : > { %v1545_v7 = vpop.f32.mrb[15].mxu0 }
 0x312   : > { %750 = vrot.lane.b32.xlu1 %v2374_v45, %s1963_s26  ;;  %s2548_s26 = sld [smem:[#allocation30_spill]] }
 0x31b   : > { %v950_v8 = vpop.xlane.xlu0 %949 }
 0x31c   : > { %v960_v9 = vsub.f32 %v804_v51, %v950_v8 }
 0x31e   : > { %v964_v10 = vmul.f32 1.442695, %v960_v9 }
 0x320   : > { %1683 = vpow2.f32 %v964_v10 }
 0x32a   : > { %v1684_v11 = vpop.eup %1683 }
 0x32b   : > { %v972_v12 = vsel %vm763_vm2, %v1684_v11, 0.0 }
 0x336   : > { %973 = vadd.xlane.f32.xlu1 %v972_v12 }
 0x38e   : > { %v953_v13 = vpop.xlane.xlu1 %952 }
 0x38f   : > { %v961_v14 = vsub.f32 %v850_v56, %v953_v13 }
 0x391   : > { %v966_v15 = vmul.f32 1.442695, %v961_v14  ;;  %v1462_v14 = vld [vmem:[%s2546_s24] ss:$0 sm:$0xff] }
 0x392   : > { %v956_v16 = vpop.xlane.xlu0 %955  ;;  %v751_v17 = vpop.permute.xlu1 %750 }
 0x393   : > { %1685 = vpow2.f32 %v966_v15  ;;  %v962_v18 = vsub.f32 %v896_v61, %v956_v16  ;;  %v760_v19 = vpack.c.bf16 %v751_v17, %v751_v17 }
 0x395   : > { %v968_v20 = vmul.f32 1.442695, %v962_v18  ;;  %v1047_v21 = vsel %vm999_vm3, %v760_v19, 0 }
 0x396   : > { %1553 = vmatpush3.bf16.msra.mxu0 %v1047_v21  ;;  %v959_v22 = vpop.xlane.xlu0 %958 }
 0x397   : > { %1687 = vpow2.f32 %v968_v20  ;;  %v963_v23 = vsub.f32 %v942_v3, %v959_v22  ;;  %1564 = vmatprep.subr.bf16.mxu0 %v1961_v0 }
 0x399   : > { %v970_v24 = vmul.f32 1.442695, %v963_v23 }
 0x39b   : > { %1689 = vpow2.f32 %v970_v24 }
 0x39d   : > { %v1686_v25 = vpop.eup %1685 }
 0x39e   : > { %v975_v26 = vsel %vm763_vm2, %v1686_v25, 0.0 }
 0x39f   : > { %976 = vadd.xlane.f32.xlu0 %v975_v26 }
 0x3a1   : > { %v1688_v27 = vpop.eup %1687 }
 0x3a2   : > { %v978_v28 = vsel %vm763_vm2, %v1688_v27, 0.0 }
 0x3a3   : > { %979 = vadd.xlane.f32.xlu1 %v978_v28 }
 0x3a5   : > { %v1690_v29 = vpop.eup %1689 }
 0x3a6   : > { %v981_v30 = vsel %vm763_vm2, %v1690_v29, 0.0 }
 0x3a7   : > { %982 = vadd.xlane.f32.xlu0 %v981_v30 }
 0x3b4   : > { %756 = vrot.lane.b32.xlu1 %v2374_v45, %s1964_s11  ;;  %s2426_s11 = scalar_lea.hbm %s2548_s26, %s1467_s17 }
 0x3bd   : > { %753 = vrot.lane.b32.xlu0 %v2374_v45, %s1965_s3  ;;  %s1969_s3 = smov [#allocation13]  }
 0x3be   : > { %s1877_s28 = sshll.u32 %s1969_s3, 4  ;;  %s1878_s28 = int_to_ptr.vmem [resolvable:$false] %s1877_s28 }
 0x3bf   : > { %s1879_s1 = scalar_lea.vmem %s1878_s28, 256  ;;  %p1880_p13 = scmp.lt.s32.totalorder %s2428_s20, %s1878_s28 }
 0x3c0   : > { %p1881_p7 = scmp.lt.s32.totalorder %s1879_s1, %s1873_s29 }
 0x3c2   : > { %p1882_p3 = por %p1881_p7, %p1880_p13 }
 0x3c3   : > { %v974_v31 = vpop.xlane.xlu1 %973 }
 0x3c4   : > { %1691 = vrcp.f32 %v974_v31  ;;  %p1883_p5 = pnand %p1882_p3, %p1876_p9 }
 0x3ce   : > { %v1692_v32 = vpop.eup %1691 }
 0x3cf   : > { %v988_v33 = vmul.f32 %v1692_v32, %v1684_v11 }
 0x3d1   : > { %v992_v34 = vpack.c.bf16 %v988_v33, %v988_v33 }
 0x3d3   : > { %1549 = vmatmul.mubr.msk.bf16.vlgmr.msra.gmra.mrb[12].mxu1 %vm763_vm2, %v992_v34 }
 0x3d4   : > { %1560 = vmatprep.mubr.msk.bf16.mxu1 %vm1962_vm0, %v1961_v0 }
 0x42c   : > { %v977_v35 = vpop.xlane.xlu0 %976 }
 0x42d   : > { %1693 = vrcp.f32 %v977_v35 }
 0x430   : > { %v980_v36 = vpop.xlane.xlu1 %979 }
 0x431   : > { %1695 = vrcp.f32 %v980_v36 }
 0x434   : > { %v983_v37 = vpop.xlane.xlu0 %982  ;;  %v757_v38 = vpop.permute.xlu1 %756 }
 0x435   : > { %1697 = vrcp.f32 %v983_v37  ;;  %v762_v41 = vpack.c.bf16 %v757_v38, %v757_v38 }
 0x437   : > { %v1694_v39 = vpop.eup %1693  ;;  %v1139_v48 = vsel %vm999_vm3, %v762_v41, 0 }
 0x438   : > { %v989_v40 = vmul.f32 %v1694_v39, %v1686_v25  ;;  %v754_v42 = vpop.permute.xlu0 %753 }
 0x439   : > { %v761_v43 = vpack.c.bf16 %v754_v42, %v754_v42 }
 0x43a   : > { %v993_v44 = vpack.c.bf16 %v989_v40, %v989_v40 }
 0x43b   : > { %v1696_v45 = vpop.eup %1695  ;;  %v1093_v46 = vsel %vm999_vm3, %v761_v43, 0 }
 0x43c   : > { %v990_v47 = vmul.f32 %v1696_v45, %v1688_v27  ;;  %1555 = vmatmul.mubr.msk.bf16.vlgmr.msra.gmra.mrb[16].mxu0 %vm763_vm2, %v993_v44  ;;  %1559 = vmatpush3.bf16.msra.mxu1 %v1093_v46 }
 0x43d   : > { %1565 = vmatpush3.bf16.msra.mxu0 %v1139_v48  ;;  %1566 = vmatprep.mubr.msk.bf16.mxu0 %vm1962_vm0, %v1961_v0 }
 0x43e   : > { %v994_v49 = vpack.c.bf16 %v990_v47, %v990_v47  ;;  %1570 = vmatprep.subr.bf16.mxu1 %v1961_v0 }
 0x43f   : > { %v1698_v50 = vpop.eup %1697 }
 0x440   : > { %v991_v51 = vmul.f32 %v1698_v50, %v1690_v29  ;;  %1561 = vmatmul.mubr.msk.bf16.vlgmr.msra.gmra.mrb[16].mxu1 %vm763_vm2, %v994_v49 }
 0x441   : > { %1574 = vmatprep.mubr.msk.bf16.mxu1 %vm1962_vm0, %v1961_v0  ;;  %1571 = vmatpush3.bf16.msra.mxu1 %v1681_v57 }
 0x442   : > { %v995_v52 = vpack.c.bf16 %v991_v51, %v991_v51  ;;  %1572 = vmatprep.subr.bf16.mxu1 %v1961_v0 }
 0x444   : > { %1567 = vmatmul.mubr.msk.bf16.vlgmr.msra.gmra.mrb[20].mxu0 %vm763_vm2, %v995_v52 }
 0x445   : > { %1573 = vmatpush3.bf16.msra.mxu1 %v1682_v58 }
 0x4a6   : > { %v1037_v53 = vpop.f32.mrb[12].mxu1 }
 0x4a7   : > { %v1550_v54 = vpop.f32.mrb[13].mxu1 }
 0x4a8   : > { %v1040_v55 = vpop.f32.mrb[14].mxu1 }
 0x4a9   : > { %v1551_v56 = vpop.f32.mrb[15].mxu1 }
 0x50f   : > { %v1083_v59 = vpop.f32.mrb[16].mxu0 }
 0x510   : > { %1182 = vrot.lane.b32.xlu1 %v1083_v59, %s1966_s13  ;;  %v1556_v60 = vpop.f32.mrb[17].mxu0 }
 0x511   : > { %v1086_v61 = vpop.f32.mrb[18].mxu0 }
 0x512   : > { %v1557_v62 = vpop.f32.mrb[19].mxu0 }
 0x513   : > { %v1129_v63 = vpop.f32.mrb[16].mxu1 }
 0x514   : > { %1186 = vrot.lane.b32.xlu0 %v1129_v63, %s1967_s27  ;;  %v1562_v1 = vpop.f32.mrb[17].mxu1 }
 0x515   : > { %v1132_v2 = vpop.f32.mrb[18].mxu1 }
 0x516   : > { %v1563_v3 = vpop.f32.mrb[19].mxu1 }
 0x517   : > { %v1175_v4 = vpop.f32.mrb[20].mxu0 }
 0x518   : > { %1190 = vrot.lane.b32.xlu1 %v1175_v4, %s1968_s30  ;;  %v1568_v0 = vpop.f32.mrb[21].mxu0 }
 0x519   : > { %v1178_v5 = vpop.f32.mrb[22].mxu0 }
 0x51a   : > { %v1569_v6 = vpop.f32.mrb[23].mxu0 }
 0x582   : > { %v1183_v7 = vpop.permute.xlu1 %1182 }
 0x583   : > { %v1193_v9 = vsel %vm763_vm2, %v1037_v53, %v1183_v7 }
 0x586   : > { %v1187_v8 = vpop.permute.xlu0 %1186 }
 0x587   : > { %v1195_v10 = vsel %vm1194_vm4, %v1193_v9, %v1187_v8 }
 0x58a   : > { %v1191_v11 = vpop.permute.xlu1 %1190 }
 0x58b   : > { %v1197_v12 = vsel %vm1196_vm5, %v1195_v10, %v1191_v11 }
 0x58c   : > { %v1198_v13 = vpack.c.bf16 %v1197_v12, %v1197_v12 }
 0x58e   : > { %1575 = vmatmul.mubr.msk.bf16.vlgmr.msra.gmra.mrb[20].mxu1 %vm543_vm1, %v1198_v13 }
 0x661   : > { %v1259_v15 = vpop.f32.mrb[20].mxu1 }
 0x662   : > { %v1260_v16 = vadd.f32 %v1462_v14, %v1259_v15  ;;  %v1576_v17 = vpop.f32.mrb[21].mxu1 }
 0x663   : > { %v1262_v18 = vpop.f32.mrb[22].mxu1 }
 0x664   : > { %v1577_v19 = vpop.f32.mrb[23].mxu1  ;;  %1265 = vst.msk [vmem:[%s514_s6] sm:$0xff] %vm543_vm1, %v1260_v16 }
 0x665   : > { %1886 = shalt.err (!%p1883_p5)
}
 0x666   : > { %s1887_s16 = scalar_lea.hbm %s2426_s11, 128  ;;  %s1891_s13 = scalar_lea.hbm %s2548_s26, 256 }
 0x667   : > { %p1888_p2 = scmp.ne.s32.totalorder %s2426_s11, %s1887_s16  ;;  %p1892_p12 = scmp.lt.u32.totalorder %s2426_s11, %s2548_s26 }
 0x668   : > { %p1893_p1 = scmp.lt.u32.totalorder %s1891_s13, %s1887_s16  ;;  %p1895_p10 = scmp.lt.u32.totalorder %s1887_s16, %s2426_s11 }
 0x669   : > { %p1889_p8 = pnand %p1888_p2, %p2549_p0 }
 0x66a   : > { %p1894_p6 = por %p1893_p1, %p1892_p12 }
 0x66b   : > { %p1890_p11 = pneg %p1889_p8 }
 0x66c   : > { %p1896_p4 = por %p1895_p10, %p1894_p6 }
 0x66e   : > { %p1897_p9 = pnand %p1896_p4, %p1890_p11 }
 0x670   : > { %1900 = shalt.err (!%p1897_p9)
}
 0x671   : > { %1596 = dma.vmem_to_hbm [thread:$0]  (%p2549_p0), %s2428_s20, 128, %s2426_s11, %s1267_s21  }
 0x672 PF: > { %s2550_s23 = sld [smem:[#allocation19_spill]]  ;;  %s2551_s12 = sld [smem:[#allocation21_spill]] }
 0x673   : > { %s2552_s24 = sld [smem:[#allocation20_spill]] }
 0x678   : > { %s1292_s17 = sand.u32 1, %s2550_s23   ;;  %p2553_p13 = scmp.ne.s32.totalorder %s2551_s12, 0 }
 0x679   : > { %p2554_p7 = scmp.ge.s32.totalorder %s2552_s24, 2  ;;  %s1293_s6 = scalar_lea.sflag [#allocation4], %s1292_s17 }
 0x67b   : > { %p1619_p3 = pnand %p2554_p7, %p2553_p13 }
 0x67d   : > { %1934 = dma.done.wait (!%p1619_p3), %s1293_s6, 128  }
 0x67e   : > { %1936 = vsyncadd (!%p1619_p3), %s1293_s6, 4294967168  ;;  %s2555_s20 = sld [smem:[#allocation22_spill]]  ;;  %s2556_s10 = sld [smem:[#allocation23_spill]] }
 0x67f   : > { %s2557_s17 = smov %s1943_s18  ;;  %s2558_s18 = smov %s1947_s19 }
 0x684   : > { %p29_p5 = scmp.ge.s32.totalorder %s2555_s20, 4   ;;  %s2559_s19 = smov %s2556_s10 }
 0x686   :  { %31 = sbr.rel (!%p29_p5) target bundleno = 16 (0x10), region = 145 }
 0x68d   :  { %1298 = vsyncpa [#allocation3], 1 }
 0x68e   :  { %1300 = vsyncpa [#allocation3 + $0x1], 1 }
 0x68f   :  { %1301 = vsyncpa [#allocation6], 1 }
 0x690   :  { %1303 = vsyncpa [#allocation6 + $0x1], 1 }
 0x691   :  { %1304 = vsyncpa [#allocation9], 1 }
 0x692   :  { %1305 = vsyncpa [#allocation12], 1 }
 0x693   :  { %1306 = vsyncpa [#allocation4], 1 }
 0x694   :  { %1308 = vsyncpa [#allocation4 + $0x1], 1 }

</bundles_post_ra>
